<compile_context>
chip_gen: v7x
topology: tpu7x:2x2x1
jax: 0.10.0
libtpu: 0.0.40
codegen_flags: <defaults>
</compile_context>

<pallas_src>
import functools

import jax
import jax.numpy as jnp
import numpy as np
from jax import lax
from jax.experimental import pallas as pl
from jax.experimental.pallas import tpu as pltpu


def _dense_layer_kernel(x_ref, s1_ref, b1_ref, w1_ref, b2_ref, mask_ref,
                        w2_ref, o_ref, *, shifts):
    """Fused bn1+relu+conv1x1+bn2+relu+conv3x3 on one (batch-block) tile.

    x_ref   : (Nb*Cin , HW)        f32   lane-dense NCHW slab
    s1_ref  : (Nb*Cin , HW)        f32   bn1 scale (pre-broadcast)
    b1_ref  : (Nb*Cin , HW)        f32   bn1 bias  (pre-broadcast)
    w1_ref  : (Nb*Cmid, Nb*Cin)    bf16  conv1 weight, batch-block-diag,
                                          bn2 scale folded in
    b2_ref  : (Nb*Cmid, HW)        f32   bn2 bias  (pre-broadcast)
    mask_ref: (9, 1, HW)           f32   3x3 zero-padding masks per tap
    w2_ref  : (Nb*Cout, 9*Nb*Cmid) bf16  conv2 weights, 9 taps merged on K
    o_ref   : (Nb*Cout, HW)        f32
    """
    # ---- norm1 + relu1 (BN folded to scale/bias; lane-dense VPU ops) ----
    t = jnp.maximum(x_ref[...] * s1_ref[...] + b1_ref[...], 0.0)

    # ---- conv1 (1x1) with bn2 scale pre-folded: single MXU matmul ----
    mid = jnp.dot(w1_ref[...], t.astype(w1_ref.dtype),
                  preferred_element_type=jnp.float32)          # (Nb*Cmid, HW)

    # ---- norm2 bias + relu2 ----
    mid = jnp.maximum(mid + b2_ref[...], 0.0)

    # ---- conv2 (3x3, stride 1, padding 1) ----
    # Each tap is a static lane roll (XLU) of `mid` followed by a 0/1 padding
    # mask (trace-time constant, so the wrapped rows/cols contribute zero).
    # All 9 taps are stacked along the contraction axis so conv2 becomes one
    # MXU matmul with K = 9*Nb*Cmid.
    taps = []
    for tap, shift in enumerate(shifts):
        if shift == 0:                      # centre tap: no roll, mask == 1
            r = mid
        else:
            r = pltpu.roll(mid, shift, axis=1) * mask_ref[tap]
        taps.append(r.astype(w2_ref.dtype))
    s9 = jnp.concatenate(taps, axis=0)      # (9*Nb*Cmid, HW) bf16

    # TODO(synk): dropout (drop_rate > 0, training=True) not implemented;
    # inference semantics (identity) are used.
    o_ref[...] = jnp.dot(w2_ref[...], s9,
                         preferred_element_type=jnp.float32).astype(o_ref.dtype)


def _build_structured_params(params, nb, H, W, compute_dtype):
    """Trace-time construction of merged / pre-broadcast weights."""
    s1 = params["bn1_scale"]
    b1 = params["bn1_bias"]
    w1 = params["w1"]                        # (Cin, Cmid)
    s2 = params["bn2_scale"]
    b2 = params["bn2_bias"]
    w2 = params["w2"]                        # (9, Cmid, Cout), tap = 3*dy + dx
    Cin, Cmid = w1.shape
    Cout = w2.shape[2]
    HW = H * W

    # Per-channel BN vectors pre-broadcast to the (batch*channel, H*W) layout.
    s1_bc = jnp.broadcast_to(s1[None, :, None], (nb, Cin, HW)
                             ).reshape(nb * Cin, HW).astype(jnp.float32)
    b1_bc = jnp.broadcast_to(b1[None, :, None], (nb, Cin, HW)
                             ).reshape(nb * Cin, HW).astype(jnp.float32)
    b2_bc = jnp.broadcast_to(b2[None, :, None], (nb, Cmid, HW)
                             ).reshape(nb * Cmid, HW).astype(jnp.float32)

    eye_b = jnp.eye(nb, dtype=jnp.float32)

    # conv1 as a batch-block-diagonal matrix with bn2 scale folded in:
    #   W1[b*Cmid+cm, b'*Cin+ci] = w1[ci, cm] * s2[cm] * (b == b')
    w1f = w1 * s2[None, :]
    w1_bd = jnp.einsum("bB,im->bmBi", eye_b, w1f).reshape(nb * Cmid, nb * Cin)

    # conv2: per-tap dense (Cmid, Cout) weights, batch-block-diagonal, all 9
    # taps concatenated along the contraction axis (single matmul in-kernel):
    #   W2[b*Cout+co, tap*nb*Cmid + b'*Cmid+cm] = w2[tap, cm, co] * (b == b')
    blocks = [jnp.einsum("bB,mo->boBm", eye_b, w2[t]).reshape(nb * Cout, nb * Cmid)
              for t in range(9)]
    w2_mat = jnp.concatenate(blocks, axis=1)        # (nb*Cout, 9*nb*Cmid)

    # 3x3 zero-padding masks per tap in the flat-lane (l = h*W + w) layout.
    hh = np.arange(HW) // W
    ww = np.arange(HW) % W
    m = np.zeros((9, 1, HW), np.float32)
    for dy in range(3):
        for dx in range(3):
            ok = ((hh + dy - 1 >= 0) & (hh + dy - 1 < H)
                  & (ww + dx - 1 >= 0) & (ww + dx - 1 < W))
            m[3 * dy + dx, 0, :] = ok
    masks = jnp.asarray(m)

    return (s1_bc, b1_bc, w1_bd.astype(compute_dtype), b2_bc, masks,
            w2_mat.astype(compute_dtype))


def dense_layer_pallas(x_nchw, params, *, batch_block=None,
                       compute_dtype=jnp.bfloat16):
    """Fused _DenseLayer forward.  x_nchw: (N, Cin, H, W) float32, NCHW.

    batch_block: number of batch items folded into one grid step.  Default is
    the whole batch (single step — best on v5e/v6e).  On v7x use N // 2 so two
    "parallel" grid steps keep both TensorCores busy.
    """
    N, Cin, H, W = x_nchw.shape
    Cmid = params["w1"].shape[1]
    Cout = params["w2"].shape[2]
    HW = H * W

    nb = N if batch_block is None else batch_block
    if N % nb != 0:
        raise ValueError(f"batch_block={nb} must divide batch={N}")

    # NCHW -> (N*Cin, H*W): free contiguous reshape (no transpose, no copy).
    x2d = x_nchw.reshape(N * Cin, HW)

    s1_bc, b1_bc, w1_bd, b2_bc, masks, w2_mat = _build_structured_params(
        params, nb, H, W, compute_dtype)

    # Static lane-roll amounts for the 9 conv2 taps (tap = 3*dy + dx):
    # source lane is l + (dy-1)*W + (dx-1)  ->  roll shift = (1-dy)*W + (1-dx).
    shifts = tuple((((1 - dy) * W + (1 - dx)) % HW)
                   for dy in range(3) for dx in range(3))

    kernel = functools.partial(_dense_layer_kernel, shifts=shifts)

    out2d = pl.pallas_call(
        kernel,
        out_shape=jax.ShapeDtypeStruct((N * Cout, HW), jnp.float32),
        grid_spec=pltpu.PrefetchScalarGridSpec(
            num_scalar_prefetch=0,
            grid=(N // nb,),
            in_specs=[
                pl.BlockSpec((nb * Cin, HW), lambda n: (n, 0)),
                pl.BlockSpec((nb * Cin, HW), lambda n: (0, 0)),
                pl.BlockSpec((nb * Cin, HW), lambda n: (0, 0)),
                pl.BlockSpec((nb * Cmid, nb * Cin), lambda n: (0, 0)),
                pl.BlockSpec((nb * Cmid, HW), lambda n: (0, 0)),
                pl.BlockSpec((9, 1, HW), lambda n: (0, 0, 0)),
                pl.BlockSpec((nb * Cout, 9 * nb * Cmid), lambda n: (0, 0)),
            ],
            out_specs=pl.BlockSpec((nb * Cout, HW), lambda n: (n, 0)),
        ),
        compiler_params=pltpu.CompilerParams(
            dimension_semantics=("parallel",)),
    )(x2d, s1_bc, b1_bc, w1_bd, b2_bc, masks, w2_mat)

    # (N*Cout, H*W) -> NCHW: again a free reshape, no transpose.
    return out2d.reshape(N, Cout, H, W)


def dense_layer_reference(x_nchw, params, compute_dtype=jnp.float32):
    """Pure-JAX reference of the same forward pass (matmul inputs cast to
    compute_dtype, f32 accumulation, to match the kernel's precision)."""
    x = jnp.transpose(x_nchw, (0, 2, 3, 1))
    t = jnp.maximum(x * params["bn1_scale"] + params["bn1_bias"], 0.0)
    mid = jnp.einsum("nhwc,cd->nhwd", t.astype(compute_dtype),
                     params["w1"].astype(compute_dtype),
                     preferred_element_type=jnp.float32)
    Cmid = mid.shape[-1]
    mid = jnp.maximum(mid * params["bn2_scale"] + params["bn2_bias"], 0.0)
    w2_hwio = params["w2"].reshape(3, 3, Cmid, -1)
    y = lax.conv_general_dilated(
        mid.astype(compute_dtype), w2_hwio.astype(compute_dtype),
        window_strides=(1, 1), padding=((1, 1), (1, 1)),
        dimension_numbers=("NHWC", "HWIO", "NHWC"),
        preferred_element_type=jnp.float32)
    return jnp.transpose(y, (0, 3, 1, 2))


def make_params(key, num_input_features, growth_rate, bn_size, eps=1e-5):
    """Deterministic synthetic parameters (BN folded to scale/bias)."""
    cmid = bn_size * growth_rate
    cout = growth_rate
    ks = jax.random.split(key, 10)

    g1 = 1.0 + 0.1 * jax.random.normal(ks[0], (num_input_features,), jnp.float32)
    be1 = 0.1 * jax.random.normal(ks[1], (num_input_features,), jnp.float32)
    rm1 = 0.1 * jax.random.normal(ks[2], (num_input_features,), jnp.float32)
    rv1 = jnp.abs(1.0 + 0.1 * jax.random.normal(ks[3], (num_input_features,), jnp.float32))
    s1 = g1 * lax.rsqrt(rv1 + eps)
    b1 = be1 - rm1 * s1

    # conv1: PyTorch weight (Cmid, Cin, 1, 1) -> kernel layout (Cin, Cmid)
    w1 = 0.1 * jax.random.normal(ks[4], (num_input_features, cmid), jnp.float32)

    g2 = 1.0 + 0.1 * jax.random.normal(ks[5], (cmid,), jnp.float32)
    be2 = 0.1 * jax.random.normal(ks[6], (cmid,), jnp.float32)
    rm2 = 0.1 * jax.random.normal(ks[7], (cmid,), jnp.float32)
    rv2 = jnp.abs(1.0 + 0.1 * jax.random.normal(ks[8], (cmid,), jnp.float32))
    s2 = g2 * lax.rsqrt(rv2 + eps)
    b2 = be2 - rm2 * s2

    # conv2: PyTorch weight (Cout, Cmid, 3, 3) -> kernel layout (9, Cmid, Cout)
    w2 = 0.1 * jax.random.normal(ks[9], (9, cmid, cout), jnp.float32)

    return {"bn1_scale": s1, "bn1_bias": b1, "w1": w1,
            "bn2_scale": s2, "bn2_bias": b2, "w2": w2}


if __name__ == "__main__":
    # Shapes consistent with the module:
    #   num_input_features=8, growth_rate=8, bn_size=4, drop_rate=0.0
    N, Cin, H, W = 2, 8, 16, 16
    growth_rate, bn_size = 8, 4

    key = jax.random.PRNGKey(0)
    kx, kp = jax.random.split(key)
    x = jax.random.normal(kx, (N, Cin, H, W), jnp.float32)
    params = make_params(kp, Cin, growth_rate, bn_size)

    y = jax.block_until_ready(dense_layer_pallas(x, params))

    # Reference with matching bf16 matmul inputs / f32 accumulation; loose
    # tolerance covers bf16 rounding plus the bn2-scale fold into w1.
    y_ref = jax.block_until_ready(
        dense_layer_reference(x, params, compute_dtype=jnp.bfloat16))

    assert y.shape == (N, growth_rate, H, W)
    np.testing.assert_allclose(np.asarray(y), np.asarray(y_ref),
                               rtol=2e-2, atol=2e-2)

    print("KERNEL_OK")
</pallas_src>

<mosaic_0001>
module attributes {stable_mosaic.version = 11 : i64} {
  func.func @_dense_layer_kernel(%arg0: i32, %arg1: memref<16x256xf32, #tpu.memory_space<vmem>>, %arg2: memref<16x256xf32, #tpu.memory_space<vmem>>, %arg3: memref<16x256xf32, #tpu.memory_space<vmem>>, %arg4: memref<64x16xbf16, #tpu.memory_space<vmem>>, %arg5: memref<64x256xf32, #tpu.memory_space<vmem>>, %arg6: memref<9x1x256xf32, #tpu.memory_space<vmem>>, %arg7: memref<16x576xbf16, #tpu.memory_space<vmem>>, %arg8: memref<16x256xf32, #tpu.memory_space<vmem>>) attributes {dimension_semantics = [#tpu.dimension_semantics<parallel>], iteration_bounds = array<i64: 1>, scalar_prefetch = 0 : i64, scratch_operands = 0 : i64, tpu.core_type = #tpu.core_type<tc>, window_params = [{transform_indices = @transform_0, window_bounds = array<i64: 16, 256>}, {pipeline_mode = #tpu.pipeline_mode<synchronous>, transform_indices = @transform_1, window_bounds = array<i64: 16, 256>}, {pipeline_mode = #tpu.pipeline_mode<synchronous>, transform_indices = @transform_2, window_bounds = array<i64: 16, 256>}, {pipeline_mode = #tpu.pipeline_mode<synchronous>, transform_indices = @transform_3, window_bounds = array<i64: 64, 16>}, {pipeline_mode = #tpu.pipeline_mode<synchronous>, transform_indices = @transform_4, window_bounds = array<i64: 64, 256>}, {pipeline_mode = #tpu.pipeline_mode<synchronous>, transform_indices = @transform_5, window_bounds = array<i64: 9, 1, 256>}, {pipeline_mode = #tpu.pipeline_mode<synchronous>, transform_indices = @transform_6, window_bounds = array<i64: 16, 576>}, {transform_indices = @transform_7, window_bounds = array<i64: 16, 256>}]} {
    %c0 = arith.constant 0 : index
    %c0_0 = arith.constant 0 : index
    %0 = vector.load %arg1[%c0, %c0_0] : memref<16x256xf32, #tpu.memory_space<vmem>>, vector<16x256xf32>
    %c0_1 = arith.constant 0 : index
    %c0_2 = arith.constant 0 : index
    %1 = vector.load %arg2[%c0_1, %c0_2] : memref<16x256xf32, #tpu.memory_space<vmem>>, vector<16x256xf32>
    %2 = arith.mulf %0, %1 : vector<16x256xf32>
    %c0_3 = arith.constant 0 : index
    %c0_4 = arith.constant 0 : index
    %3 = vector.load %arg3[%c0_3, %c0_4] : memref<16x256xf32, #tpu.memory_space<vmem>>, vector<16x256xf32>
    %4 = arith.addf %2, %3 : vector<16x256xf32>
    %cst = arith.constant 0.000000e+00 : f32
    %5 = vector.broadcast %cst : f32 to vector<16x256xf32>
    %6 = arith.maximumf %4, %5 : vector<16x256xf32>
    %c0_5 = arith.constant 0 : index
    %c0_6 = arith.constant 0 : index
    %7 = vector.load %arg4[%c0_5, %c0_6] : memref<64x16xbf16, #tpu.memory_space<vmem>>, vector<64x16xbf16>
    %8 = arith.truncf %6 : vector<16x256xf32> to vector<16x256xbf16>
    %cst_7 = arith.constant dense<0.000000e+00> : vector<64x256xf32>
    %9 = tpu.matmul %7, %8, %cst_7 {dimension_numbers = #tpu.dot_dimension_numbers<[1], [0], [0], [1], [0, 0, 1, 1], [], []>} : vector<64x16xbf16>, vector<16x256xbf16>, vector<64x256xf32> -> vector<64x256xf32>
    %c0_8 = arith.constant 0 : index
    %c0_9 = arith.constant 0 : index
    %10 = vector.load %arg5[%c0_8, %c0_9] : memref<64x256xf32, #tpu.memory_space<vmem>>, vector<64x256xf32>
    %11 = arith.addf %9, %10 : vector<64x256xf32>
    %cst_10 = arith.constant 0.000000e+00 : f32
    %12 = vector.broadcast %cst_10 : f32 to vector<64x256xf32>
    %13 = arith.maximumf %11, %12 : vector<64x256xf32>
    %c17_i32 = arith.constant 17 : i32
    %14 = tpu.dynamic_rotate %13 by %c17_i32 dim 1 : vector<64x256xf32>, i32 -> vector<64x256xf32>
    %c0_11 = arith.constant 0 : index
    %c0_12 = arith.constant 0 : index
    %c0_13 = arith.constant 0 : index
    %15 = vector.load %arg6[%c0_11, %c0_12, %c0_13] : memref<9x1x256xf32, #tpu.memory_space<vmem>>, vector<1x1x256xf32>
    %16 = vector.shape_cast %15 : vector<1x1x256xf32> to vector<1x256xf32>
    %17 = vector.broadcast %16 : vector<1x256xf32> to vector<64x256xf32>
    %18 = arith.mulf %14, %17 : vector<64x256xf32>
    %19 = arith.truncf %18 : vector<64x256xf32> to vector<64x256xbf16>
    %c16_i32 = arith.constant 16 : i32
    %20 = tpu.dynamic_rotate %13 by %c16_i32 dim 1 : vector<64x256xf32>, i32 -> vector<64x256xf32>
    %c1 = arith.constant 1 : index
    %c0_14 = arith.constant 0 : index
    %c0_15 = arith.constant 0 : index
    %21 = vector.load %arg6[%c1, %c0_14, %c0_15] : memref<9x1x256xf32, #tpu.memory_space<vmem>>, vector<1x1x256xf32>
    %22 = vector.shape_cast %21 : vector<1x1x256xf32> to vector<1x256xf32>
    %23 = vector.broadcast %22 : vector<1x256xf32> to vector<64x256xf32>
    %24 = arith.mulf %20, %23 : vector<64x256xf32>
    %25 = arith.truncf %24 : vector<64x256xf32> to vector<64x256xbf16>
    %c15_i32 = arith.constant 15 : i32
    %26 = tpu.dynamic_rotate %13 by %c15_i32 dim 1 : vector<64x256xf32>, i32 -> vector<64x256xf32>
    %c2 = arith.constant 2 : index
    %c0_16 = arith.constant 0 : index
    %c0_17 = arith.constant 0 : index
    %27 = vector.load %arg6[%c2, %c0_16, %c0_17] : memref<9x1x256xf32, #tpu.memory_space<vmem>>, vector<1x1x256xf32>
    %28 = vector.shape_cast %27 : vector<1x1x256xf32> to vector<1x256xf32>
    %29 = vector.broadcast %28 : vector<1x256xf32> to vector<64x256xf32>
    %30 = arith.mulf %26, %29 : vector<64x256xf32>
    %31 = arith.truncf %30 : vector<64x256xf32> to vector<64x256xbf16>
    %c1_i32 = arith.constant 1 : i32
    %32 = tpu.dynamic_rotate %13 by %c1_i32 dim 1 : vector<64x256xf32>, i32 -> vector<64x256xf32>
    %c3 = arith.constant 3 : index
    %c0_18 = arith.constant 0 : index
    %c0_19 = arith.constant 0 : index
    %33 = vector.load %arg6[%c3, %c0_18, %c0_19] : memref<9x1x256xf32, #tpu.memory_space<vmem>>, vector<1x1x256xf32>
    %34 = vector.shape_cast %33 : vector<1x1x256xf32> to vector<1x256xf32>
    %35 = vector.broadcast %34 : vector<1x256xf32> to vector<64x256xf32>
    %36 = arith.mulf %32, %35 : vector<64x256xf32>
    %37 = arith.truncf %36 : vector<64x256xf32> to vector<64x256xbf16>
    %38 = arith.truncf %13 : vector<64x256xf32> to vector<64x256xbf16>
    %c255_i32 = arith.constant 255 : i32
    %39 = tpu.dynamic_rotate %13 by %c255_i32 dim 1 : vector<64x256xf32>, i32 -> vector<64x256xf32>
    %c5 = arith.constant 5 : index
    %c0_20 = arith.constant 0 : index
    %c0_21 = arith.constant 0 : index
    %40 = vector.load %arg6[%c5, %c0_20, %c0_21] : memref<9x1x256xf32, #tpu.memory_space<vmem>>, vector<1x1x256xf32>
    %41 = vector.shape_cast %40 : vector<1x1x256xf32> to vector<1x256xf32>
    %42 = vector.broadcast %41 : vector<1x256xf32> to vector<64x256xf32>
    %43 = arith.mulf %39, %42 : vector<64x256xf32>
    %44 = arith.truncf %43 : vector<64x256xf32> to vector<64x256xbf16>
    %c241_i32 = arith.constant 241 : i32
    %45 = tpu.dynamic_rotate %13 by %c241_i32 dim 1 : vector<64x256xf32>, i32 -> vector<64x256xf32>
    %c6 = arith.constant 6 : index
    %c0_22 = arith.constant 0 : index
    %c0_23 = arith.constant 0 : index
    %46 = vector.load %arg6[%c6, %c0_22, %c0_23] : memref<9x1x256xf32, #tpu.memory_space<vmem>>, vector<1x1x256xf32>
    %47 = vector.shape_cast %46 : vector<1x1x256xf32> to vector<1x256xf32>
    %48 = vector.broadcast %47 : vector<1x256xf32> to vector<64x256xf32>
    %49 = arith.mulf %45, %48 : vector<64x256xf32>
    %50 = arith.truncf %49 : vector<64x256xf32> to vector<64x256xbf16>
    %c240_i32 = arith.constant 240 : i32
    %51 = tpu.dynamic_rotate %13 by %c240_i32 dim 1 : vector<64x256xf32>, i32 -> vector<64x256xf32>
    %c7 = arith.constant 7 : index
    %c0_24 = arith.constant 0 : index
    %c0_25 = arith.constant 0 : index
    %52 = vector.load %arg6[%c7, %c0_24, %c0_25] : memref<9x1x256xf32, #tpu.memory_space<vmem>>, vector<1x1x256xf32>
    %53 = vector.shape_cast %52 : vector<1x1x256xf32> to vector<1x256xf32>
    %54 = vector.broadcast %53 : vector<1x256xf32> to vector<64x256xf32>
    %55 = arith.mulf %51, %54 : vector<64x256xf32>
    %56 = arith.truncf %55 : vector<64x256xf32> to vector<64x256xbf16>
    %c239_i32 = arith.constant 239 : i32
    %57 = tpu.dynamic_rotate %13 by %c239_i32 dim 1 : vector<64x256xf32>, i32 -> vector<64x256xf32>
    %c8 = arith.constant 8 : index
    %c0_26 = arith.constant 0 : index
    %c0_27 = arith.constant 0 : index
    %58 = vector.load %arg6[%c8, %c0_26, %c0_27] : memref<9x1x256xf32, #tpu.memory_space<vmem>>, vector<1x1x256xf32>
    %59 = vector.shape_cast %58 : vector<1x1x256xf32> to vector<1x256xf32>
    %60 = vector.broadcast %59 : vector<1x256xf32> to vector<64x256xf32>
    %61 = arith.mulf %57, %60 : vector<64x256xf32>
    %62 = arith.truncf %61 : vector<64x256xf32> to vector<64x256xbf16>
    %63 = tpu.concatenate %19, %25, %31, %37, %38, %44, %50, %56, %62 in 0 : vector<64x256xbf16>, vector<64x256xbf16>, vector<64x256xbf16>, vector<64x256xbf16>, vector<64x256xbf16>, vector<64x256xbf16>, vector<64x256xbf16>, vector<64x256xbf16>, vector<64x256xbf16> -> vector<576x256xbf16>
    %c0_28 = arith.constant 0 : index
    %c0_29 = arith.constant 0 : index
    %64 = vector.load %arg7[%c0_28, %c0_29] : memref<16x576xbf16, #tpu.memory_space<vmem>>, vector<16x576xbf16>
    %cst_30 = arith.constant dense<0.000000e+00> : vector<16x256xf32>
    %65 = tpu.matmul %64, %63, %cst_30 {dimension_numbers = #tpu.dot_dimension_numbers<[1], [0], [0], [1], [0, 0, 1, 1], [], []>} : vector<16x576xbf16>, vector<576x256xbf16>, vector<16x256xf32> -> vector<16x256xf32>
    %c0_31 = arith.constant 0 : index
    %c0_32 = arith.constant 0 : index
    %66 = vector.load %arg8[%c0_31, %c0_32] : memref<16x256xf32, #tpu.memory_space<vmem>>, vector<16x256xf32>
    tpu.vector_store %arg8[%c0_31, %c0_32], %65 {strides = array<i32>} : memref<16x256xf32, #tpu.memory_space<vmem>>, vector<16x256xf32>,
    return
  }
  func.func @transform_0(%arg0: i32) -> (i32, i32) {
    %c0_i32 = arith.constant 0 : i32
    %c0_i32_0 = arith.constant 0 : i32
    return %arg0, %c0_i32 : i32, i32
  }
  func.func @transform_1(%arg0: i32) -> (i32, i32) {
    %c0_i32 = arith.constant 0 : i32
    %c0_i32_0 = arith.constant 0 : i32
    %c0_i32_1 = arith.constant 0 : i32
    return %c0_i32, %c0_i32_0 : i32, i32
  }
  func.func @transform_2(%arg0: i32) -> (i32, i32) {
    %c0_i32 = arith.constant 0 : i32
    %c0_i32_0 = arith.constant 0 : i32
    %c0_i32_1 = arith.constant 0 : i32
    return %c0_i32, %c0_i32_0 : i32, i32
  }
  func.func @transform_3(%arg0: i32) -> (i32, i32) {
    %c0_i32 = arith.constant 0 : i32
    %c0_i32_0 = arith.constant 0 : i32
    %c0_i32_1 = arith.constant 0 : i32
    return %c0_i32, %c0_i32_0 : i32, i32
  }
  func.func @transform_4(%arg0: i32) -> (i32, i32) {
    %c0_i32 = arith.constant 0 : i32
    %c0_i32_0 = arith.constant 0 : i32
    %c0_i32_1 = arith.constant 0 : i32
    return %c0_i32, %c0_i32_0 : i32, i32
  }
  func.func @transform_5(%arg0: i32) -> (i32, i32, i32) {
    %c0_i32 = arith.constant 0 : i32
    %c0_i32_0 = arith.constant 0 : i32
    %c0_i32_1 = arith.constant 0 : i32
    %c0_i32_2 = arith.constant 0 : i32
    return %c0_i32, %c0_i32_0, %c0_i32_1 : i32, i32, i32
  }
  func.func @transform_6(%arg0: i32) -> (i32, i32) {
    %c0_i32 = arith.constant 0 : i32
    %c0_i32_0 = arith.constant 0 : i32
    %c0_i32_1 = arith.constant 0 : i32
    return %c0_i32, %c0_i32_0 : i32, i32
  }
  func.func @transform_7(%arg0: i32) -> (i32, i32) {
    %c0_i32 = arith.constant 0 : i32
    %c0_i32_0 = arith.constant 0 : i32
    return %arg0, %c0_i32 : i32, i32
  }
}

</mosaic_0001>

<bundles_post_ra>
// kernel: tpu_custom_call.1
= control target key start
LH: loop header
LB: loop body
LE: loop exit
PB: predicated region body
PF: predicated region fallthrough
CT: control target
= control target key end

     0   :  { %12 = vsyncpa [#allocation3], 0  ;;  %s2701_s0 = inlined_call_operand.hbm [shape: f32[16,256], index: 0, kind: input, shape index: {}]   ;;  %s2702_s1 = inlined_call_operand.hbm [shape: f32[16,256], index: 1, kind: input, shape index: {}]   ;;  %s2703_s2 = inlined_call_operand.hbm [shape: f32[16,256], index: 2, kind: input, shape index: {}]   ;;  %s2704_s3 = inlined_call_operand.vmem [shape: bf16[64,16], index: 3, kind: input, shape index: {}]   ;;  %s2705_s4 = inlined_call_operand.hbm [shape: f32[64,256], index: 4, kind: input, shape index: {}]   ;;  %s2706_s5 = inlined_call_operand.vmem [shape: f32[9,1,256], index: 5, kind: input, shape index: {}]   ;;  %s2707_s6 = inlined_call_operand.vmem [shape: bf16[16,576], index: 6, kind: input, shape index: {}]   ;;  %s2708_s7 = inlined_call_operand.hbm [shape: f32[16,256], index: 7, kind: output, shape index: {}]  }
   0x1   :  { %13 = vsyncpa [#allocation6], 0 }
   0x2   :  { %14 = vsyncpa [#allocation9], 0 }
   0x3   :  { %15 = vsyncpa [#allocation4], 0  ;;  %s1312_s24 = smov [#allocation5]   ;;  %s1313_s26 = smov [#allocation2]  }
   0x4   :  { %s33_s25 = sshll.u32 %s1312_s24, 4  ;;  %s21_s27 = sshll.u32 %s1313_s26, 4  ;;  %s34_s25 = int_to_ptr.vmem [resolvable:$true] %s33_s25  ;;  %s1367_s27 = int_to_ptr.vmem [resolvable:$true] %s21_s27 }
   0x5   :  { %s1194_s30 = scalar_lea.hbm %s2702_s1, 512 }
   0x6   :  { %p1195_p0 = scmp.ne.s32.totalorder %s2702_s1, %s1194_s30  ;;  %p1198_p1 = scmp.lt.u32.totalorder %s1194_s30, %s2702_s1 }
   0x8   :  { %p1200_p2 = pnand %p1198_p1, %p1195_p0 }
   0xa   :  { %1203 = shalt.err (!%p1200_p2)
}
   0xb   :  { %s1204_s12 = scalar_lea.vmem %s34_s25, 512  ;;  %p1209_p4 = scmp.lt.s32.totalorder %s34_s25, %s34_s25 }
   0xc   :  { %p1205_p3 = scmp.ne.s32.totalorder %s34_s25, %s1204_s12  ;;  %p1210_p5 = scmp.lt.s32.totalorder %s1204_s12, %s1204_s12 }
   0xe   :  { %p1211_p6 = por %p1210_p5, %p1209_p4 }
  0x10   :  { %p1212_p7 = pnand %p1211_p6, %p1205_p3 }
  0x12   :  { %1215 = shalt.err (!%p1212_p7)
}
  0x13   :  { %s1314_s13 = smov 256   ;;  %s1315_s14 = smov 16  }
  0x14   :  { %39 = dma.hbm_to_vmem [thread:$0]  %s2702_s1, 512, %s34_s25, [#allocation6], %s1314_s13, %s1314_s13, %s1315_s14  }
  0x15   :  { %s1216_s19 = scalar_lea.hbm %s2701_s0, 512 }
  0x16   :  { %p1217_p8 = scmp.ne.s32.totalorder %s2701_s0, %s1216_s19  ;;  %p1220_p9 = scmp.lt.u32.totalorder %s1216_s19, %s2701_s0 }
  0x18   :  { %p1222_p10 = pnand %p1220_p9, %p1217_p8 }
  0x1a   :  { %1225 = shalt.err (!%p1222_p10)
}
  0x1b   :  { %s1226_s24 = scalar_lea.vmem %s1367_s27, 512  ;;  %p1231_p12 = scmp.lt.s32.totalorder %s1367_s27, %s1367_s27 }
  0x1c   :  { %p1227_p11 = scmp.ne.s32.totalorder %s1367_s27, %s1226_s24  ;;  %p1232_p13 = scmp.lt.s32.totalorder %s1226_s24, %s1226_s24 }
  0x1e   :  { %p1233_p0 = por %p1232_p13, %p1231_p12 }
  0x20   :  { %p1234_p1 = pnand %p1233_p0, %p1227_p11 }
  0x22   :  { %1237 = shalt.err (!%p1234_p1)
}
  0x23   :  { %27 = dma.hbm_to_vmem [thread:$0]  %s2701_s0, 512, %s1367_s27, [#allocation3], %s1314_s13, %s1314_s13, %s1315_s14  }
  0x24   :  { %s1316_s26 = smov [#allocation7]   ;;  %s1317_s29 = smov [#allocation8]  }
  0x25   :  { %s45_s28 = sshll.u32 %s1316_s26, 4  ;;  %s59_s30 = sshll.u32 %s1317_s29, 4  ;;  %s46_s28 = int_to_ptr.vmem [resolvable:$true] %s45_s28  ;;  %s1404_s30 = int_to_ptr.vmem [resolvable:$true] %s59_s30 }
  0x26   :  { %s1238_s10 = scalar_lea.hbm %s2703_s2, 512 }
  0x27   :  { %p1239_p2 = scmp.ne.s32.totalorder %s2703_s2, %s1238_s10  ;;  %p1242_p3 = scmp.lt.u32.totalorder %s1238_s10, %s2703_s2 }
  0x29   :  { %p1244_p4 = pnand %p1242_p3, %p1239_p2 }
  0x2b   :  { %1247 = shalt.err (!%p1244_p4)
}
  0x2c   :  { %s1248_s0 = scalar_lea.vmem %s46_s28, 512  ;;  %p1253_p6 = scmp.lt.s32.totalorder %s46_s28, %s46_s28 }
  0x2d   :  { %p1249_p5 = scmp.ne.s32.totalorder %s46_s28, %s1248_s0  ;;  %p1254_p7 = scmp.lt.s32.totalorder %s1248_s0, %s1248_s0 }
  0x2f   :  { %p1255_p8 = por %p1254_p7, %p1253_p6 }
  0x31   :  { %p1256_p9 = pnand %p1255_p8, %p1249_p5 }
  0x33   :  { %1259 = shalt.err (!%p1256_p9)
}
  0x34   :  { %51 = dma.hbm_to_vmem [thread:$0]  %s2703_s2, 512, %s46_s28, [#allocation6], %s1314_s13, %s1314_s13, %s1315_s14  }
  0x35   :  { %s1260_s20 = scalar_lea.hbm %s2705_s4, 2048 }
  0x36   :  { %p1261_p10 = scmp.ne.s32.totalorder %s2705_s4, %s1260_s20  ;;  %p1264_p11 = scmp.lt.u32.totalorder %s1260_s20, %s2705_s4 }
  0x38   :  { %p1266_p12 = pnand %p1264_p11, %p1261_p10 }
  0x3a   :  { %1269 = shalt.err (!%p1266_p12)
}
  0x3b   :  { %s1270_s1 = scalar_lea.vmem %s1404_s30, 2048  ;;  %p1275_p0 = scmp.lt.s32.totalorder %s1404_s30, %s1404_s30 }
  0x3c   :  { %p1271_p13 = scmp.ne.s32.totalorder %s1404_s30, %s1270_s1  ;;  %p1276_p1 = scmp.lt.s32.totalorder %s1270_s1, %s1270_s1 }
  0x3e   :  { %p1277_p2 = por %p1276_p1, %p1275_p0 }
  0x40   :  { %p1278_p3 = pnand %p1277_p2, %p1271_p13 }
  0x42   :  { %1281 = shalt.err (!%p1278_p3)
}
  0x43   :  { %65 = dma.hbm_to_vmem [thread:$0]  %s2705_s4, 2048, %s1404_s30, [#allocation9], %s1314_s13, %s1314_s13, %s1315_s14  }
  0x44   :  { %1304 = dma.done.wait [#allocation3], 512  }
  0x45   :  { %1305 = vsyncadd [#allocation3], 4294966784 }
  0x46   :  { %1306 = dma.done.wait [#allocation6], 1024  }
  0x47   :  { %1307 = vsyncadd [#allocation6], 4294966272 }
  0x48   :  { %1308 = dma.done.wait [#allocation9], 2048  }
  0x49   :  { %1309 = vsyncadd [#allocation9], 4294965248  ;;  %v2709_v0 = vmov 0   ;;  %v84_v1 = vld [vmem:[#allocation2 + $0x8] sm:$0xff]  ;;  %v86_v2 = vld [vmem:[#allocation2 + $0x18] sm:$0xff]  ;;  %vm153_vm0 = vcmask 130048  }
  0x4a   :  { %198 = vmatprep.mubr.bf16.mxu0 %v2709_v0  ;;  %v88_v3 = vld [vmem:[#allocation5 + $0x8] sm:$0xff]  ;;  %v90_v4 = vld [vmem:[#allocation5 + $0x18] sm:$0xff]  ;;  %v83_v9 = vld [vmem:[#allocation2] sm:$0xff]  ;;  %s1320_s11 = smov 127   ;;  %s1321_s12 = smov 113   ;;  %vm983_vm9 = vcmask 523264  }
  0x4b   :  { %v92_v5 = vmul.f32 %v88_v3, %v84_v1  ;;  %v96_v6 = vld [vmem:[#allocation7 + $0x8] sm:$0xff]  ;;  %v98_v7 = vld [vmem:[#allocation7 + $0x18] sm:$0xff]  ;;  %v94_v8 = vmul.f32 %v90_v4, %v86_v2  ;;  %v85_v10 = vld [vmem:[#allocation2 + $0x10] sm:$0xff]  ;;  %s1322_s15 = smov 15   ;;  %s1323_s16 = smov 112  }
  0x4c   :  { %v87_v11 = vld [vmem:[#allocation5] sm:$0xff]  ;;  %v89_v13 = vld [vmem:[#allocation5 + $0x10] sm:$0xff]  ;;  %v1184_v28 = vld [vmem:[%s2704_s3 + $0x8] sm:$0xff]   ;;  %s1324_s0 = smov 1   ;;  %s1325_s27 = smov 111  }
  0x4d   :  { %v100_v12 = vadd.f32 %v96_v6, %v92_v5  ;;  %v91_v14 = vmul.f32 %v87_v11, %v83_v9  ;;  %v95_v15 = vld [vmem:[#allocation7] sm:$0xff]  ;;  %v97_v16 = vld [vmem:[#allocation7 + $0x10] sm:$0xff]  ;;  %v102_v17 = vadd.f32 %v98_v7, %v94_v8  ;;  %v93_v18 = vmul.f32 %v89_v13, %v85_v10  ;;  %v1186_v30 = vld [vmem:[%s2704_s3 + $0x18] sm:$0xff]  }
  0x4e   :  { %v1183_v27 = vld [vmem:[%s2704_s3] sm:$0xff]   ;;  %v1185_v29 = vld [vmem:[%s2704_s3 + $0x10] sm:$0xff]   ;;  %v118_v32 = vld [vmem:[#allocation8 + $0x8] sm:$0xff]  ;;  %s1319_s3 = smov 17  }
  0x4f   :  { %v104_v19 = vmax.f32 %v100_v12, 0.0  ;;  %v99_v20 = vadd.f32 %v95_v15, %v91_v14  ;;  %v106_v21 = vmax.f32 %v102_v17, 0.0  ;;  %v101_v22 = vadd.f32 %v97_v16, %v93_v18  ;;  %v117_v31 = vld [vmem:[#allocation8] sm:$0xff]  ;;  %v119_v34 = vld [vmem:[#allocation8 + $0x10] sm:$0xff]  ;;  %v120_v37 = vld [vmem:[#allocation8 + $0x18] sm:$0xff] }
  0x50   :  { %v121_v47 = vld [vmem:[#allocation8 + $0x20] sm:$0xff]  ;;  %v122_v49 = vld [vmem:[#allocation8 + $0x28] sm:$0xff]  ;;  %v123_v52 = vld [vmem:[#allocation8 + $0x30] sm:$0xff] }
  0x51   :  { %v103_v23 = vmax.f32 %v99_v20, 0.0  ;;  %v116_v24 = vpack.c.bf16 %v106_v21, %v104_v19  ;;  %v105_v25 = vmax.f32 %v101_v22, 0.0  ;;  %v124_v55 = vld [vmem:[#allocation8 + $0x38] sm:$0xff]  ;;  %v125_v2 = vld [vmem:[#allocation8 + $0x40] sm:$0xff]  ;;  %v126_v4 = vld [vmem:[#allocation8 + $0x48] sm:$0xff] }
  0x52   :  { %v127_v7 = vld [vmem:[#allocation8 + $0x50] sm:$0xff]  ;;  %v128_v10 = vld [vmem:[#allocation8 + $0x58] sm:$0xff]  ;;  %v129_v20 = vld [vmem:[#allocation8 + $0x60] sm:$0xff] }
  0x53   :  { %166 = vmatprep.subr.bf16.mxu0 %v116_v24  ;;  %v115_v26 = vpack.c.bf16 %v105_v25, %v103_v23  ;;  %v130_v22 = vld [vmem:[#allocation8 + $0x68] sm:$0xff]  ;;  %v131_v25 = vld [vmem:[#allocation8 + $0x70] sm:$0xff] }
  0x55   :  { %167 = vmatpush1.bf16.msra.mxu0 %v115_v26 }
  0x58   :  { %1143 = vmatmul.mubr.msk.bf16.vlgmr.msra.gmra.mrb[0].mxu0 %vm153_vm0, %v1183_v27 }
  0x59   :  { %208 = vmatprep.mubr.bf16.mxu0 %v2709_v0 }
  0x60   :  { %1144 = vmatmul.mubr.msk.bf16.gmra.mrb[4].mxu0 %vm153_vm0, %v1184_v28  ;;  %v132_v28 = vld [vmem:[#allocation8 + $0x78] sm:$0xff] }
  0x61   :  { %218 = vmatprep.mubr.bf16.mxu0 %v2709_v0 }
  0x68   :  { %1145 = vmatmul.mubr.msk.bf16.gmra.mrb[8].mxu0 %vm153_vm0, %v1185_v29 }
  0x69   :  { %228 = vmatprep.mubr.bf16.mxu0 %v2709_v0 }
  0x70   :  { %1146 = vmatmul.mubr.msk.bf16.gmra.mrb[12].mxu0 %vm153_vm0, %v1186_v30 }
 0x12b   :  { %v200_v33 = vpop.f32.mrb[0].mxu0 }
 0x12c   :  { %v201_v35 = vadd.f32 %v200_v33, %v117_v31  ;;  %v202_v36 = vpop.f32.mrb[1].mxu0 }
 0x12d   :  { %v203_v38 = vadd.f32 %v202_v36, %v118_v32  ;;  %v204_v39 = vpop.f32.mrb[2].mxu0 }
 0x12e   :  { %v1457_v40 = vmax.f32 %v201_v35, 0.0  ;;  %v205_v41 = vadd.f32 %v204_v39, %v119_v34  ;;  %v206_v42 = vpop.f32.mrb[3].mxu0 }
 0x12f   :  { %v1459_v43 = vmax.f32 %v203_v38, 0.0  ;;  %v207_v44 = vadd.f32 %v206_v42, %v120_v37 }
 0x130   :  { %v1461_v45 = vmax.f32 %v205_v41, 0.0  ;;  %255 = vrot.lane.b32.xlu0 %v1457_v40, %s1319_s3 }
 0x131   :  { %v1465_v46 = vmax.f32 %v207_v44, 0.0  ;;  %271 = vrot.lane.b32.xlu1 %v1459_v43, %s1319_s3 }
 0x132   :  { %v600_v48 = vpack.c.bf16 %v1461_v45, %v1457_v40 }
 0x133   :  { %v601_v50 = vpack.c.bf16 %v1465_v46, %v1459_v43  ;;  %v210_v51 = vpop.f32.mrb[4].mxu0 }
 0x134   :  { %608 = vrot.lane.b32.xlu0 %v1457_v40, %s1320_s11  ;;  %v211_v53 = vadd.f32 %v210_v51, %v121_v47  ;;  %v212_v54 = vpop.f32.mrb[5].mxu0 }
 0x135   :  { %610 = vrot.lane.b32.xlu1 %v1461_v45, %s1320_s11  ;;  %1030 = vmatprep.subr.bf16.mxu1 %v601_v50  ;;  %v213_v56 = vadd.f32 %v212_v54, %v122_v49  ;;  %v214_v57 = vpop.f32.mrb[6].mxu0 }
 0x136   :  { %1031 = vmatpush1.bf16.msra.mxu1 %v600_v48  ;;  %v1477_v58 = vmax.f32 %v211_v53, 0.0  ;;  %v215_v59 = vadd.f32 %v214_v57, %v123_v52  ;;  %v216_v60 = vpop.f32.mrb[7].mxu0  ;;  %v287_v52 = vlaneseq }
 0x137   :  { %v1479_v61 = vmax.f32 %v213_v56, 0.0  ;;  %v217_v62 = vadd.f32 %v216_v60, %v124_v55 }
 0x138   :  { %342 = vrot.lane.b32.xlu0 %v1457_v40, %s1315_s14  ;;  %v1483_v63 = vmax.f32 %v215_v59, 0.0  ;;  %v309_v55 = vshrl.u32 %v287_v52, 7  ;;  %v1147_v59 = vld [vmem:[%s2706_s5 + $0x2] sm:$0x3] }
 0x139   :  { %344 = vrot.lane.b32.xlu1 %v1461_v45, %s1315_s14  ;;  %v1487_v1 = vmax.f32 %v217_v62, 0.0  ;;  %v1150_v62 = vld [vmem:[%s2706_s5 + $0xa] sm:$0x3] }
 0x13a   :  { %v602_v3 = vpack.c.bf16 %v1483_v63, %v1477_v58  ;;  %v1684_v60 = vsub.s32 0, %v309_v55 }
 0x13b   :  { %v603_v5 = vpack.c.bf16 %v1487_v1, %v1479_v61  ;;  %v220_v6 = vpop.f32.mrb[8].mxu0 }
 0x13c   :  { %694 = vrot.lane.b32.xlu0 %v1457_v40, %s1321_s12  ;;  %v221_v8 = vadd.f32 %v220_v6, %v125_v2  ;;  %v222_v9 = vpop.f32.mrb[9].mxu0  ;;  %v1698_v2 = vrot.slane %v1147_v59, %v1684_v60 }
 0x13d   :  { %696 = vrot.lane.b32.xlu1 %v1461_v45, %s1321_s12  ;;  %1032 = vmatprep.subr.bf16.mxu1 %v603_v5  ;;  %v223_v11 = vadd.f32 %v222_v9, %v126_v4  ;;  %v224_v12 = vpop.f32.mrb[10].mxu0  ;;  %v1151_v4 = vld [vmem:[%s2706_s5 + $0xc] sm:$0x3]  ;;  %v1707_v5 = vrot.slane %v1150_v62, %v1684_v60 }
 0x13e   :  { %1033 = vmatpush1.bf16.msra.mxu1 %v602_v3  ;;  %v1497_v13 = vmax.f32 %v221_v8, 0.0  ;;  %v225_v14 = vadd.f32 %v224_v12, %v127_v7  ;;  %v226_v15 = vpop.f32.mrb[11].mxu0 }
 0x13f   :  { %v1499_v16 = vmax.f32 %v223_v11, 0.0  ;;  %v227_v17 = vadd.f32 %v226_v15, %v128_v10 }
 0x140   :  { %428 = vrot.lane.b32.xlu0 %v1457_v40, %s1322_s15  ;;  %v1503_v18 = vmax.f32 %v225_v14, 0.0  ;;  %v1724_v14 = vrot.slane %v1151_v4, %v1684_v60 }
 0x141   :  { %430 = vrot.lane.b32.xlu1 %v1461_v45, %s1322_s15  ;;  %v1507_v19 = vmax.f32 %v227_v17, 0.0  ;;  %v1148_v17 = vld [vmem:[%s2706_s5 + $0x4] sm:$0x3] }
 0x142   :  { %v604_v21 = vpack.c.bf16 %v1503_v18, %v1497_v13 }
 0x143   :  { %v605_v23 = vpack.c.bf16 %v1507_v19, %v1499_v16  ;;  %v230_v24 = vpop.f32.mrb[12].mxu0 }
 0x144   :  { %780 = vrot.lane.b32.xlu0 %v1457_v40, %s1323_s16  ;;  %v231_v26 = vadd.f32 %v230_v24, %v129_v20  ;;  %v232_v27 = vpop.f32.mrb[13].mxu0 }
 0x145   :  { %782 = vrot.lane.b32.xlu1 %v1461_v45, %s1323_s16  ;;  %1034 = vmatprep.subr.bf16.mxu1 %v605_v23  ;;  %v233_v29 = vadd.f32 %v232_v27, %v130_v22  ;;  %v234_v30 = vpop.f32.mrb[14].mxu0 }
 0x146   :  { %1035 = vmatpush1.bf16.msra.mxu1 %v604_v21  ;;  %v1517_v31 = vmax.f32 %v231_v26, 0.0  ;;  %v235_v32 = vadd.f32 %v234_v30, %v131_v25  ;;  %v236_v33 = vpop.f32.mrb[15].mxu0 }
 0x147   :  { %v1519_v34 = vmax.f32 %v233_v29, 0.0  ;;  %v237_v35 = vadd.f32 %v236_v33, %v132_v28  ;;  %v1752_v29 = vrot.slane %v1148_v17, %v1684_v60 }
 0x148   :  { %514 = vrot.lane.b32.xlu0 %v1457_v40, %s1324_s0  ;;  %v1523_v36 = vmax.f32 %v235_v32, 0.0 }
 0x149   :  { %516 = vrot.lane.b32.xlu1 %v1461_v45, %s1324_s0  ;;  %v1527_v37 = vmax.f32 %v237_v35, 0.0 }
 0x14a   :  { %v606_v38 = vpack.c.bf16 %v1523_v36, %v1517_v31 }
 0x14b   :  { %v607_v39 = vpack.c.bf16 %v1527_v37, %v1519_v34 }
 0x14c   :  { %866 = vrot.lane.b32.xlu0 %v1457_v40, %s1325_s27 }
 0x14d   :  { %868 = vrot.lane.b32.xlu1 %v1461_v45, %s1325_s27  ;;  %1036 = vmatprep.subr.bf16.mxu1 %v607_v39 }
 0x14e   :  { %1037 = vmatpush1.bf16.msra.mxu1 %v606_v38 }
 0x150   :  { %624 = vrot.lane.b32.xlu0 %v1459_v43, %s1320_s11 }
 0x151   :  { %273 = vrot.lane.b32.xlu1 %v1465_v46, %s1319_s3 }
 0x154   :  { %358 = vrot.lane.b32.xlu0 %v1459_v43, %s1315_s14 }
 0x155   :  { %626 = vrot.lane.b32.xlu1 %v1465_v46, %s1320_s11 }
 0x158   :  { %710 = vrot.lane.b32.xlu0 %v1459_v43, %s1321_s12 }
 0x159   :  { %360 = vrot.lane.b32.xlu1 %v1465_v46, %s1315_s14 }
 0x15c   :  { %444 = vrot.lane.b32.xlu0 %v1459_v43, %s1322_s15 }
 0x15d   :  { %712 = vrot.lane.b32.xlu1 %v1465_v46, %s1321_s12 }
 0x160   :  { %796 = vrot.lane.b32.xlu0 %v1459_v43, %s1323_s16 }
 0x161   :  { %446 = vrot.lane.b32.xlu1 %v1465_v46, %s1322_s15 }
 0x164   :  { %530 = vrot.lane.b32.xlu0 %v1459_v43, %s1324_s0 }
 0x165   :  { %798 = vrot.lane.b32.xlu1 %v1465_v46, %s1323_s16 }
 0x168   :  { %882 = vrot.lane.b32.xlu0 %v1459_v43, %s1325_s27 }
 0x169   :  { %532 = vrot.lane.b32.xlu1 %v1465_v46, %s1324_s0 }
 0x16c   :  { %257 = vrot.lane.b32.xlu0 %v1461_v45, %s1319_s3 }
 0x16d   :  { %884 = vrot.lane.b32.xlu1 %v1465_v46, %s1325_s27 }
 0x170   :  { %259 = vrot.lane.b32.xlu0 %v1477_v58, %s1319_s3 }
 0x171   :  { %261 = vrot.lane.b32.xlu1 %v1483_v63, %s1319_s3 }
 0x174   :  { %612 = vrot.lane.b32.xlu0 %v1477_v58, %s1320_s11 }
 0x175   :  { %614 = vrot.lane.b32.xlu1 %v1483_v63, %s1320_s11 }
 0x178   :  { %346 = vrot.lane.b32.xlu0 %v1477_v58, %s1315_s14 }
 0x179   :  { %348 = vrot.lane.b32.xlu1 %v1483_v63, %s1315_s14 }
 0x17c   :  { %698 = vrot.lane.b32.xlu0 %v1477_v58, %s1321_s12 }
 0x17d   :  { %700 = vrot.lane.b32.xlu1 %v1483_v63, %s1321_s12 }
 0x180   :  { %432 = vrot.lane.b32.xlu0 %v1477_v58, %s1322_s15 }
 0x181   :  { %434 = vrot.lane.b32.xlu1 %v1483_v63, %s1322_s15 }
 0x184   :  { %784 = vrot.lane.b32.xlu0 %v1477_v58, %s1323_s16 }
 0x185   :  { %786 = vrot.lane.b32.xlu1 %v1483_v63, %s1323_s16 }
 0x188   :  { %518 = vrot.lane.b32.xlu0 %v1477_v58, %s1324_s0 }
 0x189   :  { %520 = vrot.lane.b32.xlu1 %v1483_v63, %s1324_s0 }
 0x18c   :  { %870 = vrot.lane.b32.xlu0 %v1477_v58, %s1325_s27  ;;  %v1677_v58 = vand.u32 127, %v287_v52 }
 0x18d   :  { %872 = vrot.lane.b32.xlu1 %v1483_v63, %s1325_s27 }
 0x18e   :  { %vm640_vm1 = vcmp.lt.s32.totalorder %v1677_v58, 127  ;;  %vm374_vm2 = vcmp.lt.s32.totalorder %v1677_v58, 16  ;;  %vm726_vm3 = vcmp.lt.s32.totalorder %v1677_v58, 113  ;;  %vm460_vm4 = vcmp.lt.s32.totalorder %v1677_v58, 15 }
 0x18f   :  { %vm812_vm5 = vcmp.lt.s32.totalorder %v1677_v58, 112  ;;  %vm546_vm6 = vcmp.lt.s32.totalorder %v1677_v58, 1  ;;  %vm289_vm7 = vcmp.lt.s32.totalorder %v1677_v58, 17  ;;  %vm898_vm8 = vcmp.lt.s32.totalorder %v1677_v58, 111  ;;  %v1193_v58 = vld [vmem:[%s2707_s6 + $0x10] ss:$20 sps:$4 sm:$0xff]  }
 0x190   :  { %275 = vrot.lane.b32.xlu0 %v1479_v61, %s1319_s3 }
 0x191   :  { %277 = vrot.lane.b32.xlu1 %v1487_v1, %s1319_s3 }
 0x194   :  { %628 = vrot.lane.b32.xlu0 %v1479_v61, %s1320_s11 }
 0x195   :  { %630 = vrot.lane.b32.xlu1 %v1487_v1, %s1320_s11 }
 0x198   :  { %362 = vrot.lane.b32.xlu0 %v1479_v61, %s1315_s14 }
 0x199   :  { %364 = vrot.lane.b32.xlu1 %v1487_v1, %s1315_s14 }
 0x19c   :  { %714 = vrot.lane.b32.xlu0 %v1479_v61, %s1321_s12 }
 0x19d   :  { %716 = vrot.lane.b32.xlu1 %v1487_v1, %s1321_s12 }
 0x1a0   :  { %448 = vrot.lane.b32.xlu0 %v1479_v61, %s1322_s15 }
 0x1a1   :  { %450 = vrot.lane.b32.xlu1 %v1487_v1, %s1322_s15 }
 0x1a2   :  { %v1621_v40 = vpop.permute.xlu0 %255 }
 0x1a3   :  { %v1623_v41 = vpop.permute.xlu1 %271 }
 0x1a4   :  { %800 = vrot.lane.b32.xlu0 %v1479_v61, %s1323_s16 }
 0x1a5   :  { %802 = vrot.lane.b32.xlu1 %v1487_v1, %s1323_s16 }
 0x1a6   :  { %v609_v42 = vpop.permute.xlu0 %608 }
 0x1a7   :  { %v611_v43 = vpop.permute.xlu1 %610 }
 0x1a8   :  { %534 = vrot.lane.b32.xlu0 %v1479_v61, %s1324_s0 }
 0x1a9   :  { %536 = vrot.lane.b32.xlu1 %v1487_v1, %s1324_s0 }
 0x1aa   :  { %v343_v44 = vpop.permute.xlu0 %342 }
 0x1ab   :  { %v1633_v45 = vpop.permute.xlu1 %344 }
 0x1ac   :  { %886 = vrot.lane.b32.xlu0 %v1479_v61, %s1325_s27  ;;  %v1686_v61 = vsub.s32 1, %v309_v55 }
 0x1ad   :  { %888 = vrot.lane.b32.xlu1 %v1487_v1, %s1325_s27 }
 0x1ae   :  { %v1639_v46 = vpop.permute.xlu0 %694  ;;  %v1701_v3 = vrot.slane %v1147_v59, %v1686_v61  ;;  %v1710_v6 = vrot.slane %v1150_v62, %v1686_v61  ;;  %v1727_v15 = vrot.slane %v1151_v4, %v1686_v61  ;;  %v1755_v30 = vrot.slane %v1148_v17, %v1686_v61 }
 0x1af   :  { %v1641_v47 = vpop.permute.xlu1 %696 }
 0x1b0   :  { %263 = vrot.lane.b32.xlu0 %v1497_v13, %s1319_s3 }
 0x1b1   :  { %265 = vrot.lane.b32.xlu1 %v1503_v18, %s1319_s3 }
 0x1b2   :  { %v1647_v48 = vpop.permute.xlu0 %428 }
 0x1b3   :  { %v1649_v49 = vpop.permute.xlu1 %430 }
 0x1b4   :  { %616 = vrot.lane.b32.xlu0 %v1497_v13, %s1320_s11 }
 0x1b5   :  { %618 = vrot.lane.b32.xlu1 %v1503_v18, %s1320_s11 }
 0x1b6   :  { %v1655_v50 = vpop.permute.xlu0 %780 }
 0x1b7   :  { %v1657_v51 = vpop.permute.xlu1 %782 }
 0x1b8   :  { %350 = vrot.lane.b32.xlu0 %v1497_v13, %s1315_s14 }
 0x1b9   :  { %352 = vrot.lane.b32.xlu1 %v1503_v18, %s1315_s14 }
 0x1ba   :  { %v1663_v53 = vpop.permute.xlu0 %514 }
 0x1bb   :  { %v1665_v54 = vpop.permute.xlu1 %516 }
 0x1bc   :  { %702 = vrot.lane.b32.xlu0 %v1497_v13, %s1321_s12 }
 0x1bd   :  { %704 = vrot.lane.b32.xlu1 %v1503_v18, %s1321_s12 }
 0x1be   :  { %v1671_v56 = vpop.permute.xlu0 %866 }
 0x1bf   :  { %v1673_v57 = vpop.permute.xlu1 %868 }
 0x1c0   :  { %436 = vrot.lane.b32.xlu0 %v1497_v13, %s1322_s15 }
 0x1c1   :  { %438 = vrot.lane.b32.xlu1 %v1503_v18, %s1322_s15 }
 0x1c2   :  { %v625_v63 = vpop.permute.xlu0 %624 }
 0x1c3   :  { %v1692_v1 = vpop.permute.xlu1 %273  ;;  %v641_v7 = vsel %vm640_vm1, %v609_v42, %v625_v63  ;;  %v649_v8 = vsel %vm640_vm1, %v625_v63, %v609_v42  ;;  %v1152_v42 = vld [vmem:[%s2706_s5 + $0xe] sm:$0x3] }
 0x1c4   :  { %788 = vrot.lane.b32.xlu0 %v1497_v13, %s1323_s16  ;;  %v670_v24 = vmul.f32 %v1707_v5, %v641_v7  ;;  %v671_v25 = vmul.f32 %v1710_v6, %v649_v8  ;;  %v1790_v63 = vrot.slane %v1152_v42, %v1684_v60 }
 0x1c5   :  { %790 = vrot.lane.b32.xlu1 %v1503_v18, %s1323_s16 }
 0x1c6   :  { %v359_v9 = vpop.permute.xlu0 %358 }
 0x1c7   :  { %v375_v10 = vsel %vm374_vm2, %v343_v44, %v359_v9  ;;  %v383_v11 = vsel %vm374_vm2, %v359_v9, %v343_v44  ;;  %v627_v12 = vpop.permute.xlu1 %626 }
 0x1c8   :  { %v1733_v20 = vmul.f32 %v1698_v2, %v383_v11  ;;  %v1736_v21 = vmul.f32 %v1701_v3, %v375_v10  ;;  %v642_v22 = vsel %vm640_vm1, %v611_v43, %v627_v12  ;;  %v650_v23 = vsel %vm640_vm1, %v627_v12, %v611_v43  ;;  %279 = vrot.lane.b32.xlu0 %v1499_v16, %s1319_s3  ;;  %v1149_v10 = vld [vmem:[%s2706_s5 + $0x6] sm:$0x3] }
 0x1c9   :  { %v672_v26 = vmul.f32 %v1707_v5, %v642_v22  ;;  %v673_v27 = vmul.f32 %v1710_v6, %v650_v23  ;;  %281 = vrot.lane.b32.xlu1 %v1507_v19, %s1319_s3 }
 0x1ca   :  { %v711_v28 = vpop.permute.xlu0 %710 }
 0x1cb   :  { %v727_v32 = vsel %vm726_vm3, %v1639_v46, %v711_v28  ;;  %v735_v33 = vsel %vm726_vm3, %v711_v28, %v1639_v46  ;;  %v361_v35 = vpop.permute.xlu1 %360  ;;  %v687_v38 = vpack.c.bf16 %v673_v27, %v671_v25  ;;  %v686_v39 = vpack.c.bf16 %v672_v26, %v670_v24 }
 0x1cc   :  { %v1767_v43 = vmul.f32 %v1724_v14, %v727_v32  ;;  %v1770_v44 = vmul.f32 %v1727_v15, %v735_v33  ;;  %v376_v52 = vsel %vm374_vm2, %v1633_v45, %v361_v35  ;;  %v384_v46 = vsel %vm374_vm2, %v361_v35, %v1633_v45  ;;  %632 = vrot.lane.b32.xlu0 %v1499_v16, %s1320_s11  ;;  %v1153_v33 = vld [vmem:[%s2706_s5 + $0x10] sm:$0x3] }
 0x1cd   :  { %v1781_v55 = vmul.f32 %v1698_v2, %v384_v46  ;;  %v1784_v59 = vmul.f32 %v1701_v3, %v376_v52  ;;  %634 = vrot.lane.b32.xlu1 %v1507_v19, %s1320_s11  ;;  %1038 = vmatprep.subr.bf16.mxu1 %v687_v38  ;;  %v1793_v45 = vrot.slane %v1152_v42, %v1686_v61 }
 0x1ce   :  { %v445_v62 = vpop.permute.xlu0 %444  ;;  %1039 = vmatpush1.bf16.msra.mxu1 %v686_v39  ;;  %v1832_v26 = vrot.slane %v1149_v10, %v1684_v60 }
 0x1cf   :  { %2756 = vst [vmem:[#allocation15_spill] sm:$0xff] %v1793_v45  ;;  %v461_v7 = vsel %vm460_vm4, %v1647_v48, %v445_v62  ;;  %v469_v8 = vsel %vm460_vm4, %v445_v62, %v1647_v48  ;;  %v713_v9 = vpop.permute.xlu1 %712 }
 0x1d0   :  { %v1809_v12 = vmul.f32 %v1752_v29, %v469_v8  ;;  %v1812_v17 = vmul.f32 %v1755_v30, %v461_v7  ;;  %v728_v22 = vsel %vm726_vm3, %v1641_v47, %v713_v9  ;;  %v736_v48 = vsel %vm726_vm3, %v713_v9, %v1641_v47  ;;  %366 = vrot.lane.b32.xlu0 %v1499_v16, %s1315_s14  ;;  %v306_v9 = vld [vmem:[%s2706_s5] sm:$0x3] }
 0x1d1   :  { %v1823_v23 = vmul.f32 %v1724_v14, %v728_v22  ;;  %v1826_v24 = vmul.f32 %v1727_v15, %v736_v48  ;;  %368 = vrot.lane.b32.xlu1 %v1507_v19, %s1315_s14  ;;  %v1835_v47 = vrot.slane %v1149_v10, %v1686_v61  ;;  %v1875_v8 = vrot.slane %v1153_v33, %v1684_v60 }
 0x1d2   :  { %2757 = vst [vmem:[#allocation16_spill] sm:$0xff] %v1809_v12  ;;  %v797_v25 = vpop.permute.xlu0 %796 }
 0x1d3   :  { %v813_v27 = vsel %vm812_vm5, %v1655_v50, %v797_v25  ;;  %v821_v28 = vsel %vm812_vm5, %v797_v25, %v1655_v50  ;;  %v447_v32 = vpop.permute.xlu1 %446  ;;  %2761 = vst [vmem:[#allocation20_spill] sm:$0xff] %v1875_v8 }
 0x1d4   :  { %v1851_v39 = vmul.f32 %v1790_v63, %v813_v27  ;;  %v1854_v42 = vmul.f32 %v1793_v45, %v821_v28  ;;  %v462_v50 = vsel %vm460_vm4, %v1649_v49, %v447_v32  ;;  %v470_v52 = vsel %vm460_vm4, %v447_v32, %v1649_v49  ;;  %718 = vrot.lane.b32.xlu0 %v1499_v16, %s1321_s12 }
 0x1d5   :  { %v1865_v46 = vmul.f32 %v1752_v29, %v470_v52  ;;  %v1868_v62 = vmul.f32 %v1755_v30, %v462_v50  ;;  %720 = vrot.lane.b32.xlu1 %v1507_v19, %s1321_s12  ;;  %v1878_v49 = vrot.slane %v1153_v33, %v1686_v61 }
 0x1d6   :  { %2758 = vst [vmem:[#allocation17_spill] sm:$0xff] %v1851_v39  ;;  %2759 = vst [vmem:[#allocation18_spill] sm:$0xff] %v1854_v42  ;;  %v531_v7 = vpop.permute.xlu0 %530 }
 0x1d7   :  { %2760 = vst [vmem:[#allocation19_spill] sm:$0xff] %v1865_v46  ;;  %2762 = vst [vmem:[#allocation21_spill] sm:$0xff] %v1878_v49  ;;  %v547_v22 = vsel %vm546_vm6, %v1663_v53, %v531_v7  ;;  %v555_v48 = vsel %vm546_vm6, %v531_v7, %v1663_v53  ;;  %v799_v25 = vpop.permute.xlu1 %798  ;;  %v1916_v7 = vrot.slane %v306_v9, %v1684_v60 }
 0x1d8   :  { %v1894_v28 = vmul.f32 %v1832_v26, %v555_v48  ;;  %v1897_v32 = vmul.f32 %v1835_v47, %v547_v22  ;;  %v814_v33 = vsel %vm812_vm5, %v1657_v51, %v799_v25  ;;  %v822_v50 = vsel %vm812_vm5, %v799_v25, %v1657_v51  ;;  %452 = vrot.lane.b32.xlu0 %v1499_v16, %s1322_s15 }
 0x1d9   :  { %v1908_v53 = vmul.f32 %v1790_v63, %v814_v33  ;;  %v1911_v52 = vmul.f32 %v1793_v45, %v822_v50  ;;  %454 = vrot.lane.b32.xlu1 %v1507_v19, %s1322_s15  ;;  %v1919_v22 = vrot.slane %v306_v9, %v1686_v61  ;;  %v290_v51 = vsel %vm289_vm7, %v1621_v40, %v1623_v41 }
 0x1da   :  { %2763 = vst [vmem:[#allocation22_spill] sm:$0xff] %v1894_v28  ;;  %2764 = vst [vmem:[#allocation23_spill] sm:$0xff] %v1897_v32  ;;  %v298_v48 = vsel %vm289_vm7, %v1623_v41, %v1621_v40  ;;  %v883_v25 = vpop.permute.xlu0 %882 }
 0x1db   :  { %2765 = vst [vmem:[#allocation24_spill] sm:$0xff] %v1908_v53  ;;  %2766 = vst [vmem:[#allocation25_spill] sm:$0xff] %v1911_v52  ;;  %v899_v33 = vsel %vm898_vm8, %v1671_v56, %v883_v25  ;;  %v907_v60 = vsel %vm898_vm8, %v883_v25, %v1671_v56  ;;  %v533_v61 = vpop.permute.xlu1 %532  ;;  %v319_v50 = vmul.f32 %v1919_v22, %v290_v51 }
 0x1dc   :  { %v1940_v0 = vmul.f32 %v1875_v8, %v899_v33  ;;  %v1943_v40 = vmul.f32 %v1878_v49, %v907_v60  ;;  %v548_v41 = vsel %vm546_vm6, %v1665_v54, %v533_v61  ;;  %v556_v56 = vsel %vm546_vm6, %v533_v61, %v1665_v54  ;;  %804 = vrot.lane.b32.xlu0 %v1499_v16, %s1323_s16 }
 0x1dd   :  { %v1954_v25 = vmul.f32 %v1832_v26, %v556_v56  ;;  %v1957_v33 = vmul.f32 %v1835_v47, %v548_v41  ;;  %806 = vrot.lane.b32.xlu1 %v1507_v19, %s1323_s16  ;;  %v318_v60 = vmul.f32 %v1916_v7, %v298_v48 }
 0x1de   :  { %2767 = vst [vmem:[#allocation26_spill] sm:$0xff] %v1940_v0  ;;  %2768 = vst [vmem:[#allocation27_spill] sm:$0xff] %v1943_v40  ;;  %v258_v9 = vpop.permute.xlu0 %257 }
 0x1df   :  { %2769 = vst [vmem:[#allocation28_spill] sm:$0xff] %v1954_v25  ;;  %2770 = vst [vmem:[#allocation29_spill] sm:$0xff] %v1957_v33  ;;  %v291_v61 = vsel %vm289_vm7, %v258_v9, %v1692_v1  ;;  %v299_v41 = vsel %vm289_vm7, %v1692_v1, %v258_v9  ;;  %v885_v56 = vpop.permute.xlu1 %884 }
 0x1e0   :  { %v320_v48 = vmul.f32 %v1916_v7, %v299_v41  ;;  %v321_v51 = vmul.f32 %v1919_v22, %v291_v61  ;;  %v900_v54 = vsel %vm898_vm8, %v1673_v57, %v885_v56  ;;  %v908_v27 = vsel %vm898_vm8, %v885_v56, %v1673_v57  ;;  %267 = vrot.lane.b32.xlu0 %v1517_v31, %s1319_s3 }
 0x1e1   :  { %v1984_v1 = vmul.f32 %v1875_v8, %v900_v54  ;;  %v1987_v9 = vmul.f32 %v1878_v49, %v908_v27  ;;  %269 = vrot.lane.b32.xlu1 %v1523_v36, %s1319_s3 }
 0x1e2   :  { %v334_v61 = vpack.c.bf16 %v320_v48, %v318_v60  ;;  %v260_v41 = vpop.permute.xlu0 %259  ;;  %v335_v10 = vpack.c.bf16 %v321_v51, %v319_v50 }
 0x1e3   :  { %2771 = vst [vmem:[#allocation30_spill] sm:$0xff] %v1984_v1  ;;  %2772 = vst [vmem:[#allocation31_spill] sm:$0xff] %v1987_v9  ;;  %v262_v35 = vpop.permute.xlu1 %261 }
 0x1e4   :  { %620 = vrot.lane.b32.xlu0 %v1517_v31, %s1320_s11  ;;  %987 = vmatprep.subr.bf16.mxu0 %v335_v10 }
 0x1e5   :  { %622 = vrot.lane.b32.xlu1 %v1523_v36, %s1320_s11  ;;  %988 = vmatpush1.bf16.msra.mxu0 %v334_v61 }
 0x1e6   :  { %v613_v27 = vpop.permute.xlu0 %612 }
 0x1e7   :  { %v615_v54 = vpop.permute.xlu1 %614 }
 0x1e8   :  { %354 = vrot.lane.b32.xlu0 %v1517_v31, %s1315_s14 }
 0x1e9   :  { %356 = vrot.lane.b32.xlu1 %v1523_v36, %s1315_s14 }
 0x1ea   :  { %v347_v50 = vpop.permute.xlu0 %346 }
 0x1eb   :  { %v349_v60 = vpop.permute.xlu1 %348 }
 0x1ec   :  { %706 = vrot.lane.b32.xlu0 %v1517_v31, %s1321_s12 }
 0x1ed   :  { %708 = vrot.lane.b32.xlu1 %v1523_v36, %s1321_s12 }
 0x1ee   :  { %v2007_v10 = vpop.permute.xlu0 %698 }
 0x1ef   :  { %v2009_v56 = vpop.permute.xlu1 %700 }
 0x1f0   :  { %440 = vrot.lane.b32.xlu0 %v1517_v31, %s1322_s15 }
 0x1f1   :  { %442 = vrot.lane.b32.xlu1 %v1523_v36, %s1322_s15 }
 0x1f2   :  { %v2015_v48 = vpop.permute.xlu0 %432 }
 0x1f3   :  { %v2017_v51 = vpop.permute.xlu1 %434 }
 0x1f4   :  { %792 = vrot.lane.b32.xlu0 %v1517_v31, %s1323_s16 }
 0x1f5   :  { %794 = vrot.lane.b32.xlu1 %v1523_v36, %s1323_s16 }
 0x1f6   :  { %v2023_v61 = vpop.permute.xlu0 %784 }
 0x1f7   :  { %v2025_v38 = vpop.permute.xlu1 %786 }
 0x1f8   :  { %283 = vrot.lane.b32.xlu0 %v1519_v34, %s1319_s3 }
 0x1f9   :  { %285 = vrot.lane.b32.xlu1 %v1527_v37, %s1319_s3 }
 0x1fa   :  { %v2031_v57 = vpop.permute.xlu0 %518 }
 0x1fb   :  { %v2033_v4 = vpop.permute.xlu1 %520 }
 0x1fc   :  { %636 = vrot.lane.b32.xlu0 %v1519_v34, %s1320_s11 }
 0x1fd   :  { %638 = vrot.lane.b32.xlu1 %v1527_v37, %s1320_s11 }
 0x1fe   :  { %v2039_v11 = vpop.permute.xlu0 %870 }
 0x1ff   :  { %v2041_v0 = vpop.permute.xlu1 %872 }
 0x200   :  { %522 = vrot.lane.b32.xlu0 %v1497_v13, %s1324_s0 }
 0x201   :  { %524 = vrot.lane.b32.xlu1 %v1503_v18, %s1324_s0 }
 0x202   :  { %v276_v1 = vpop.permute.xlu0 %275 }
 0x203   :  { %v292_v40 = vsel %vm289_vm7, %v260_v41, %v276_v1  ;;  %v300_v9 = vsel %vm289_vm7, %v276_v1, %v260_v41  ;;  %v278_v28 = vpop.permute.xlu1 %277 }
 0x204   :  { %v322_v25 = vmul.f32 %v1916_v7, %v300_v9  ;;  %v323_v32 = vmul.f32 %v1919_v22, %v292_v40  ;;  %v293_v33 = vsel %vm289_vm7, %v262_v35, %v278_v28  ;;  %v301_v39 = vsel %vm289_vm7, %v278_v28, %v262_v35  ;;  %370 = vrot.lane.b32.xlu0 %v1519_v34, %s1315_s14 }
 0x205   :  { %v324_v53 = vmul.f32 %v1916_v7, %v301_v39  ;;  %v325_v42 = vmul.f32 %v1919_v22, %v293_v33  ;;  %540 = vrot.lane.b32.xlu1 %v1507_v19, %s1324_s0 }
 0x206   :  { %v629_v1 = vpop.permute.xlu0 %628 }
 0x207   :  { %v336_v9 = vpack.c.bf16 %v324_v53, %v322_v25  ;;  %v643_v40 = vsel %vm640_vm1, %v613_v27, %v629_v1  ;;  %v651_v41 = vsel %vm640_vm1, %v629_v1, %v613_v27  ;;  %v631_v52 = vpop.permute.xlu1 %630  ;;  %v337_v35 = vpack.c.bf16 %v325_v42, %v323_v32 }
 0x208   :  { %v674_v28 = vmul.f32 %v1707_v5, %v643_v40  ;;  %v675_v12 = vmul.f32 %v1710_v6, %v651_v41  ;;  %v644_v39 = vsel %vm640_vm1, %v615_v54, %v631_v52  ;;  %v652_v33 = vsel %vm640_vm1, %v631_v52, %v615_v54  ;;  %722 = vrot.lane.b32.xlu0 %v1519_v34, %s1321_s12 }
 0x209   :  { %v676_v53 = vmul.f32 %v1707_v5, %v644_v39  ;;  %v677_v25 = vmul.f32 %v1710_v6, %v652_v33  ;;  %372 = vrot.lane.b32.xlu1 %v1527_v37, %s1315_s14  ;;  %989 = vmatprep.subr.bf16.mxu0 %v337_v35 }
 0x20a   :  { %990 = vmatpush1.bf16.msra.mxu0 %v336_v9  ;;  %v363_v42 = vpop.permute.xlu0 %362 }
 0x20b   :  { %v377_v32 = vsel %vm374_vm2, %v347_v50, %v363_v42  ;;  %v385_v27 = vsel %vm374_vm2, %v363_v42, %v347_v50  ;;  %v365_v52 = vpop.permute.xlu1 %364  ;;  %v689_v54 = vpack.c.bf16 %v677_v25, %v675_v12  ;;  %v688_v1 = vpack.c.bf16 %v676_v53, %v674_v28 }
 0x20c   :  { %v2084_v40 = vmul.f32 %v1698_v2, %v385_v27  ;;  %v2087_v41 = vmul.f32 %v1701_v3, %v377_v32  ;;  %v378_v35 = vsel %vm374_vm2, %v349_v60, %v365_v52  ;;  %v386_v9 = vsel %vm374_vm2, %v365_v52, %v349_v60  ;;  %456 = vrot.lane.b32.xlu0 %v1519_v34, %s1322_s15 }
 0x20d   :  { %v2096_v50 = vmul.f32 %v1698_v2, %v386_v9  ;;  %v2099_v12 = vmul.f32 %v1701_v3, %v378_v35  ;;  %724 = vrot.lane.b32.xlu1 %v1527_v37, %s1321_s12  ;;  %1040 = vmatprep.subr.bf16.mxu1 %v689_v54 }
 0x20e   :  { %v715_v28 = vpop.permute.xlu0 %714  ;;  %1041 = vmatpush1.bf16.msra.mxu1 %v688_v1 }
 0x20f   :  { %v729_v60 = vsel %vm726_vm3, %v2007_v10, %v715_v28  ;;  %v737_v33 = vsel %vm726_vm3, %v715_v28, %v2007_v10  ;;  %v717_v53 = vpop.permute.xlu1 %716 }
 0x210   :  { %v2114_v42 = vmul.f32 %v1724_v14, %v729_v60  ;;  %v2117_v32 = vmul.f32 %v1727_v15, %v737_v33  ;;  %v730_v27 = vsel %vm726_vm3, %v2009_v56, %v717_v53  ;;  %v738_v52 = vsel %vm726_vm3, %v717_v53, %v2009_v56  ;;  %808 = vrot.lane.b32.xlu0 %v1519_v34, %s1323_s16 }
 0x211   :  { %v2128_v10 = vmul.f32 %v1724_v14, %v730_v27  ;;  %v2131_v54 = vmul.f32 %v1727_v15, %v738_v52  ;;  %876 = vrot.lane.b32.xlu1 %v1503_v18, %s1325_s27 }
 0x212   :  { %v449_v1 = vpop.permute.xlu0 %448 }
 0x213   :  { %v463_v35 = vsel %vm460_vm4, %v2015_v48, %v449_v1  ;;  %v471_v56 = vsel %vm460_vm4, %v449_v1, %v2015_v48  ;;  %v451_v9 = vpop.permute.xlu1 %450 }
 0x214   :  { %v2146_v33 = vmul.f32 %v1752_v29, %v471_v56  ;;  %v2149_v18 = vmul.f32 %v1755_v30, %v463_v35  ;;  %v464_v53 = vsel %vm460_vm4, %v2017_v51, %v451_v9  ;;  %v472_v48 = vsel %vm460_vm4, %v451_v9, %v2017_v51  ;;  %538 = vrot.lane.b32.xlu0 %v1499_v16, %s1324_s0 }
 0x215   :  { %v2160_v27 = vmul.f32 %v1752_v29, %v472_v48  ;;  %v2163_v52 = vmul.f32 %v1755_v30, %v464_v53  ;;  %892 = vrot.lane.b32.xlu1 %v1507_v19, %s1325_s27  ;;  %v1189_v19 = vld [vmem:[%s2707_s6 + $0xc] ss:$20 sps:$4 sm:$0xff]  }
 0x216   :  { %2773 = vst [vmem:[#allocation32_spill] sm:$0xff] %v2146_v33  ;;  %2774 = vst [vmem:[#allocation33_spill] sm:$0xff] %v2149_v18  ;;  %v801_v1 = vpop.permute.xlu0 %800  ;;  %1062 = vmatprep.mubr.bf16.mxu1 %v1189_v19 }
 0x217   :  { %2775 = vst [vmem:[#allocation34_spill] sm:$0xff] %v2160_v27  ;;  %2776 = vst [vmem:[#allocation35_spill] sm:$0xff] %v2163_v52  ;;  %v815_v51 = vsel %vm812_vm5, %v2023_v61, %v801_v1  ;;  %v823_v56 = vsel %vm812_vm5, %v801_v1, %v2023_v61  ;;  %v803_v9 = vpop.permute.xlu1 %802 }
 0x218   :  { %v2181_v48 = vmul.f32 %v1790_v63, %v815_v51  ;;  %v2184_v35 = vmul.f32 %v1793_v45, %v823_v56  ;;  %v816_v60 = vsel %vm812_vm5, %v2025_v38, %v803_v9  ;;  %v824_v61 = vsel %vm812_vm5, %v803_v9, %v2025_v38  ;;  %874 = vrot.lane.b32.xlu0 %v1497_v13, %s1325_s27 }
 0x219   :  { %v2195_v1 = vmul.f32 %v1790_v63, %v816_v60  ;;  %v2198_v51 = vmul.f32 %v1793_v45, %v824_v61  ;;  %458 = vrot.lane.b32.xlu1 %v1527_v37, %s1322_s15 }
 0x21a   :  { %2777 = vst [vmem:[#allocation36_spill] sm:$0xff] %v2181_v48  ;;  %2778 = vst [vmem:[#allocation37_spill] sm:$0xff] %v2184_v35  ;;  %v535_v56 = vpop.permute.xlu0 %534 }
 0x21b   :  { %2779 = vst [vmem:[#allocation38_spill] sm:$0xff] %v2195_v1  ;;  %2780 = vst [vmem:[#allocation39_spill] sm:$0xff] %v2198_v51  ;;  %v549_v53 = vsel %vm546_vm6, %v2031_v57, %v535_v56  ;;  %v557_v38 = vsel %vm546_vm6, %v535_v56, %v2031_v57  ;;  %v537_v13 = vpop.permute.xlu1 %536 }
 0x21c   :  { %v2213_v61 = vmul.f32 %v1832_v26, %v557_v38  ;;  %v2216_v19 = vmul.f32 %v1835_v47, %v549_v53  ;;  %v550_v28 = vsel %vm546_vm6, %v2033_v4, %v537_v13  ;;  %v558_v57 = vsel %vm546_vm6, %v537_v13, %v2033_v4  ;;  %890 = vrot.lane.b32.xlu0 %v1499_v16, %s1325_s27 }
 0x21d   :  { %v2227_v56 = vmul.f32 %v1832_v26, %v558_v57  ;;  %v2230_v38 = vmul.f32 %v1835_v47, %v550_v28  ;;  %810 = vrot.lane.b32.xlu1 %v1527_v37, %s1323_s16 }
 0x21e   :  { %2781 = vst [vmem:[#allocation40_spill] sm:$0xff] %v2213_v61  ;;  %2782 = vst [vmem:[#allocation41_spill] sm:$0xff] %v2216_v19  ;;  %v887_v53 = vpop.permute.xlu0 %886 }
 0x21f   :  { %2783 = vst [vmem:[#allocation42_spill] sm:$0xff] %v2227_v56  ;;  %2784 = vst [vmem:[#allocation43_spill] sm:$0xff] %v2230_v38  ;;  %v901_v4 = vsel %vm898_vm8, %v2039_v11, %v887_v53  ;;  %v909_v16 = vsel %vm898_vm8, %v887_v53, %v2039_v11  ;;  %v889_v13 = vpop.permute.xlu1 %888 }
 0x220   :  { %v2245_v57 = vmul.f32 %v1875_v8, %v901_v4  ;;  %v2248_v60 = vmul.f32 %v1878_v49, %v909_v16  ;;  %v902_v9 = vsel %vm898_vm8, %v2041_v0, %v889_v13  ;;  %v910_v39 = vsel %vm898_vm8, %v889_v13, %v2041_v0  ;;  %526 = vrot.lane.b32.xlu0 %v1517_v31, %s1324_s0  ;;  %v1192_v13 = vld [vmem:[%s2707_s6 + $0x4] ss:$20 sps:$4 sm:$0xff]  }
 0x221   :  { %v2259_v11 = vmul.f32 %v1875_v8, %v902_v9  ;;  %v2262_v53 = vmul.f32 %v1878_v49, %v910_v39  ;;  %528 = vrot.lane.b32.xlu1 %v1523_v36, %s1324_s0  ;;  %1019 = vmatprep.mubr.bf16.mxu0 %v1192_v13 }
 0x222   :  { %2785 = vst [vmem:[#allocation44_spill] sm:$0xff] %v2245_v57  ;;  %2786 = vst [vmem:[#allocation45_spill] sm:$0xff] %v2248_v60  ;;  %v264_v4 = vpop.permute.xlu0 %263 }
 0x223   :  { %2787 = vst [vmem:[#allocation46_spill] sm:$0xff] %v2259_v11  ;;  %2788 = vst [vmem:[#allocation47_spill] sm:$0xff] %v2262_v53  ;;  %v266_v28 = vpop.permute.xlu1 %265 }
 0x224   :  { %542 = vrot.lane.b32.xlu0 %v1519_v34, %s1324_s0 }
 0x225   :  { %880 = vrot.lane.b32.xlu1 %v1523_v36, %s1325_s27 }
 0x226   :  { %v617_v39 = vpop.permute.xlu0 %616 }
 0x227   :  { %v619_v9 = vpop.permute.xlu1 %618 }
 0x228   :  { %878 = vrot.lane.b32.xlu0 %v1517_v31, %s1325_s27 }
 0x229   :  { %544 = vrot.lane.b32.xlu1 %v1527_v37, %s1324_s0 }
 0x22a   :  { %v351_v16 = vpop.permute.xlu0 %350 }
 0x22b   :  { %v353_v0 = vpop.permute.xlu1 %352 }
 0x22c   :  { %894 = vrot.lane.b32.xlu0 %v1519_v34, %s1325_s27 }
 0x22d   :  { %896 = vrot.lane.b32.xlu1 %v1527_v37, %s1325_s27  ;;  %s1326_s27 = smov [#allocation10]  }
 0x22e   :  { %v703_v25 = vpop.permute.xlu0 %702  ;;  %s1125_s17 = sshll.u32 %s1326_s27, 4  ;;  %s1126_s17 = int_to_ptr.vmem [resolvable:$true] %s1125_s17 }
 0x22f   :  { %v705_v57 = vpop.permute.xlu1 %704  ;;  %p1287_p5 = scmp.lt.s32.totalorder %s1126_s17, %s1126_s17 }
 0x232   :  { %v437_v36 = vpop.permute.xlu0 %436 }
 0x233   :  { %v2285_v13 = vpop.permute.xlu1 %438 }
 0x236   :  { %v2287_v11 = vpop.permute.xlu0 %788 }
 0x237   :  { %v2289_v60 = vpop.permute.xlu1 %790 }
 0x23a   :  { %v280_v31 = vpop.permute.xlu0 %279 }
 0x23b   :  { %v294_v53 = vsel %vm289_vm7, %v264_v4, %v280_v31  ;;  %v302_v61 = vsel %vm289_vm7, %v280_v31, %v264_v4  ;;  %v282_v34 = vpop.permute.xlu1 %281 }
 0x23c   :  { %v326_v56 = vmul.f32 %v1916_v7, %v302_v61  ;;  %v327_v37 = vmul.f32 %v1919_v22, %v294_v53  ;;  %v295_v19 = vsel %vm289_vm7, %v266_v28, %v282_v34  ;;  %v303_v38 = vsel %vm289_vm7, %v282_v34, %v266_v28 }
 0x23d   :  { %v328_v48 = vmul.f32 %v1916_v7, %v303_v38  ;;  %v329_v1 = vmul.f32 %v1919_v22, %v295_v19 }
 0x23e   :  { %v633_v35 = vpop.permute.xlu0 %632 }
 0x23f   :  { %v338_v51 = vpack.c.bf16 %v328_v48, %v326_v56  ;;  %v645_v4 = vsel %vm640_vm1, %v617_v39, %v633_v35  ;;  %v653_v61 = vsel %vm640_vm1, %v633_v35, %v617_v39  ;;  %v635_v31 = vpop.permute.xlu1 %634  ;;  %v339_v53 = vpack.c.bf16 %v329_v1, %v327_v37 }
 0x240   :  { %v678_v33 = vmul.f32 %v1707_v5, %v645_v4  ;;  %v679_v27 = vmul.f32 %v1710_v6, %v653_v61  ;;  %v646_v28 = vsel %vm640_vm1, %v619_v9, %v635_v31  ;;  %v654_v19 = vsel %vm640_vm1, %v635_v31, %v619_v9 }
 0x241   :  { %v680_v48 = vmul.f32 %v1707_v5, %v646_v28  ;;  %v681_v56 = vmul.f32 %v1710_v6, %v654_v19  ;;  %991 = vmatprep.subr.bf16.mxu0 %v339_v53 }
 0x242   :  { %992 = vmatpush1.bf16.msra.mxu0 %v338_v51  ;;  %v367_v38 = vpop.permute.xlu0 %366 }
 0x243   :  { %v379_v35 = vsel %vm374_vm2, %v351_v16, %v367_v38  ;;  %v387_v1 = vsel %vm374_vm2, %v367_v38, %v351_v16  ;;  %v369_v39 = vpop.permute.xlu1 %368  ;;  %v691_v34 = vpack.c.bf16 %v681_v56, %v679_v27  ;;  %v690_v37 = vpack.c.bf16 %v680_v48, %v678_v33 }
 0x244   :  { %v2320_v4 = vmul.f32 %v1698_v2, %v387_v1  ;;  %v2323_v9 = vmul.f32 %v1701_v3, %v379_v35  ;;  %v380_v61 = vsel %vm374_vm2, %v353_v0, %v369_v39  ;;  %v388_v51 = vsel %vm374_vm2, %v369_v39, %v353_v0 }
 0x245   :  { %v2330_v31 = vmul.f32 %v1698_v2, %v388_v51  ;;  %v2333_v16 = vmul.f32 %v1701_v3, %v380_v61  ;;  %1042 = vmatprep.subr.bf16.mxu1 %v691_v34 }
 0x246   :  { %v719_v33 = vpop.permute.xlu0 %718  ;;  %1043 = vmatpush1.bf16.msra.mxu1 %v690_v37 }
 0x247   :  { %v731_v53 = vsel %vm726_vm3, %v703_v25, %v719_v33  ;;  %v739_v28 = vsel %vm726_vm3, %v719_v33, %v703_v25  ;;  %v721_v19 = vpop.permute.xlu1 %720 }
 0x248   :  { %v2344_v48 = vmul.f32 %v1724_v14, %v731_v53  ;;  %v2347_v56 = vmul.f32 %v1727_v15, %v739_v28  ;;  %v732_v38 = vsel %vm726_vm3, %v705_v57, %v721_v19  ;;  %v740_v35 = vsel %vm726_vm3, %v721_v19, %v705_v57 }
 0x249   :  { %v2354_v1 = vmul.f32 %v1724_v14, %v732_v38  ;;  %v2357_v25 = vmul.f32 %v1727_v15, %v740_v35 }
 0x24a   :  { %v453_v39 = vpop.permute.xlu0 %452 }
 0x24b   :  { %v465_v34 = vsel %vm460_vm4, %v437_v36, %v453_v39  ;;  %v473_v37 = vsel %vm460_vm4, %v453_v39, %v437_v36  ;;  %v455_v61 = vpop.permute.xlu1 %454 }
 0x24c   :  { %v2368_v33 = vmul.f32 %v1752_v29, %v473_v37  ;;  %v2371_v53 = vmul.f32 %v1755_v30, %v465_v34  ;;  %v466_v28 = vsel %vm460_vm4, %v2285_v13, %v455_v61  ;;  %v474_v36 = vsel %vm460_vm4, %v455_v61, %v2285_v13 }
 0x24d   :  { %v2380_v19 = vmul.f32 %v1752_v29, %v474_v36  ;;  %v2383_v38 = vmul.f32 %v1755_v30, %v466_v28 }
 0x24e   :  { %2789 = vst [vmem:[#allocation48_spill] sm:$0xff] %v2368_v33  ;;  %2790 = vst [vmem:[#allocation49_spill] sm:$0xff] %v2371_v53  ;;  %v805_v35 = vpop.permute.xlu0 %804 }
 0x24f   :  { %2791 = vst [vmem:[#allocation50_spill] sm:$0xff] %v2380_v19  ;;  %2792 = vst [vmem:[#allocation51_spill] sm:$0xff] %v2383_v38  ;;  %v817_v34 = vsel %vm812_vm5, %v2287_v11, %v805_v35  ;;  %v825_v37 = vsel %vm812_vm5, %v805_v35, %v2287_v11  ;;  %v807_v57 = vpop.permute.xlu1 %806 }
 0x250   :  { %v2396_v61 = vmul.f32 %v1790_v63, %v817_v34  ;;  %v2399_v28 = vmul.f32 %v1793_v45, %v825_v37  ;;  %v818_v36 = vsel %vm812_vm5, %v2289_v60, %v807_v57  ;;  %v826_v39 = vsel %vm812_vm5, %v807_v57, %v2289_v60 }
 0x251   :  { %v2408_v11 = vmul.f32 %v1790_v63, %v818_v36  ;;  %v2411_v35 = vmul.f32 %v1793_v45, %v826_v39 }
 0x252   :  { %2793 = vst [vmem:[#allocation52_spill] sm:$0xff] %v2396_v61  ;;  %2794 = vst [vmem:[#allocation53_spill] sm:$0xff] %v2399_v28  ;;  %v268_v13 = vpop.permute.xlu0 %267 }
 0x253   :  { %2795 = vst [vmem:[#allocation54_spill] sm:$0xff] %v2408_v11  ;;  %2796 = vst [vmem:[#allocation55_spill] sm:$0xff] %v2411_v35  ;;  %v270_v34 = vpop.permute.xlu1 %269 }
 0x256   :  { %v621_v27 = vpop.permute.xlu0 %620 }
 0x257   :  { %v623_v0 = vpop.permute.xlu1 %622 }
 0x25a   :  { %v355_v33 = vpop.permute.xlu0 %354 }
 0x25b   :  { %v2417_v19 = vpop.permute.xlu1 %356 }
 0x25e   :  { %v707_v60 = vpop.permute.xlu0 %706 }
 0x25f   :  { %v2419_v57 = vpop.permute.xlu1 %708 }
 0x262   :  { %v2421_v36 = vpop.permute.xlu0 %440 }
 0x263   :  { %v2423_v39 = vpop.permute.xlu1 %442 }
 0x264   :  { %2797 = vst [vmem:[#allocation56_spill] sm:$0xff] %v2423_v39 }
 0x266   :  { %v2425_v53 = vpop.permute.xlu0 %792 }
 0x267   :  { %v2427_v38 = vpop.permute.xlu1 %794 }
 0x268   :  { %2798 = vst [vmem:[#allocation57_spill] sm:$0xff] %v2427_v38 }
 0x26a   :  { %v284_v37 = vpop.permute.xlu0 %283 }
 0x26b   :  { %v296_v51 = vsel %vm289_vm7, %v268_v13, %v284_v37  ;;  %v304_v61 = vsel %vm289_vm7, %v284_v37, %v268_v13  ;;  %v286_v11 = vpop.permute.xlu1 %285 }
 0x26c   :  { %v330_v28 = vmul.f32 %v1916_v7, %v304_v61  ;;  %v331_v35 = vmul.f32 %v1919_v22, %v296_v51  ;;  %v297_v49 = vsel %vm289_vm7, %v270_v34, %v286_v11  ;;  %v305_v39 = vsel %vm289_vm7, %v286_v11, %v270_v34 }
 0x26d   :  { %v332_v38 = vmul.f32 %v1916_v7, %v305_v39  ;;  %v333_v8 = vmul.f32 %v1919_v22, %v297_v49 }
 0x26e   :  { %v637_v18 = vpop.permute.xlu0 %636 }
 0x26f   :  { %v340_v52 = vpack.c.bf16 %v332_v38, %v330_v28  ;;  %v647_v13 = vsel %vm640_vm1, %v621_v27, %v637_v18  ;;  %v655_v61 = vsel %vm640_vm1, %v637_v18, %v621_v27  ;;  %v639_v37 = vpop.permute.xlu1 %638  ;;  %v341_v51 = vpack.c.bf16 %v333_v8, %v331_v35 }
 0x270   :  { %v682_v46 = vmul.f32 %v1707_v5, %v647_v13  ;;  %v683_v45 = vmul.f32 %v1710_v6, %v655_v61  ;;  %v648_v11 = vsel %vm640_vm1, %v623_v0, %v639_v37  ;;  %v656_v49 = vsel %vm640_vm1, %v639_v37, %v623_v0 }
 0x271   :  { %v684_v7 = vmul.f32 %v1707_v5, %v648_v11  ;;  %v685_v22 = vmul.f32 %v1710_v6, %v656_v49  ;;  %993 = vmatprep.subr.bf16.mxu0 %v341_v51  ;;  %v2799_v8 = vpack.c.bf16 %v1784_v59, %v1736_v21  ;;  %v2800_v35 = vpack.c.bf16 %v1781_v55, %v1733_v20 }
 0x272   :  { %994 = vmatpush1.bf16.msra.mxu0 %v340_v52  ;;  %v2453_v38 = vpop.permute.xlu0 %522  ;;  %v2801_v21 = vpack.c.bf16 %v2099_v12, %v2087_v41  ;;  %v2802_v59 = vpack.c.bf16 %v1826_v24, %v1770_v44  ;;  %v2803_v44 = vpack.c.bf16 %v2096_v50, %v2084_v40  ;;  %v2804_v12 = vpack.c.bf16 %v1823_v23, %v1767_v43 }
 0x273   :  { %v525_v18 = vpop.permute.xlu1 %524  ;;  %995 = vmatprep.subr.bf16.mxu0 %v2799_v8  ;;  %v693_v27 = vpack.c.bf16 %v685_v22, %v683_v45  ;;  %v692_v28 = vpack.c.bf16 %v684_v7, %v682_v46  ;;  %v2805_v61 = vpack.c.bf16 %v2333_v16, %v2323_v9  ;;  %v2806_v40 = vpack.c.bf16 %v2131_v54, %v2117_v32 }
 0x274   :  { %v2807_v32 = vpack.c.bf16 %v2330_v31, %v2320_v4  ;;  %v2808_v16 = vpack.c.bf16 %v2128_v10, %v2114_v42 }
 0x275   :  { %1044 = vmatprep.subr.bf16.mxu1 %v693_v27 }
 0x276   :  { %996 = vmatpush1.bf16.msra.mxu0 %v2800_v35  ;;  %v371_v0 = vpop.permute.xlu0 %370  ;;  %1045 = vmatpush1.bf16.msra.mxu1 %v692_v28  ;;  %v2812_v28 = vld [vmem:[#allocation15_spill] sm:$0xff]  ;;  %v2814_v35 = vld [vmem:[#allocation16_spill] sm:$0xff] }
 0x277   :  { %v381_v5 = vsel %vm374_vm2, %v355_v33, %v371_v0  ;;  %v389_v6 = vsel %vm374_vm2, %v371_v0, %v355_v33  ;;  %v541_v52 = vpop.permute.xlu1 %540  ;;  %997 = vmatprep.subr.bf16.mxu0 %v2801_v21  ;;  %1046 = vmatprep.subr.bf16.mxu1 %v2802_v59  ;;  %v2819_v59 = vld [vmem:[#allocation25_spill] sm:$0xff] }
 0x278   :  { %v416_v20 = vmul.f32 %v1698_v2, %v389_v6  ;;  %v417_v55 = vmul.f32 %v1701_v3, %v381_v5  ;;  %v552_v45 = vsel %vm546_vm6, %v525_v18, %v541_v52  ;;  %v560_v46 = vsel %vm546_vm6, %v541_v52, %v525_v18  ;;  %v2816_v6 = vld [vmem:[#allocation35_spill] sm:$0xff]  ;;  %v2817_v52 = vld [vmem:[#allocation33_spill] sm:$0xff] }
 0x279   :  { %v2478_v33 = vmul.f32 %v1832_v26, %v560_v46  ;;  %v2481_v41 = vmul.f32 %v1835_v47, %v552_v45  ;;  %v2818_v21 = vpack.c.bf16 %v2816_v6, %v2817_v52 }
 0x27a   :  { %998 = vmatpush1.bf16.msra.mxu0 %v2803_v44  ;;  %v723_v24 = vpop.permute.xlu0 %722  ;;  %1047 = vmatpush1.bf16.msra.mxu1 %v2804_v12 }
 0x27b   :  { %v733_v34 = vsel %vm726_vm3, %v707_v60, %v723_v24  ;;  %v741_v39 = vsel %vm726_vm3, %v723_v24, %v707_v60  ;;  %v373_v13 = vpop.permute.xlu1 %372  ;;  %999 = vmatprep.subr.bf16.mxu0 %v2805_v61  ;;  %1048 = vmatprep.subr.bf16.mxu1 %v2806_v40  ;;  %v2822_v24 = vld [vmem:[#allocation20_spill] sm:$0xff]  ;;  %v2824_v61 = vld [vmem:[#allocation34_spill] sm:$0xff] }
 0x27c   :  { %v768_v50 = vmul.f32 %v1724_v14, %v733_v34  ;;  %v769_v43 = vmul.f32 %v1727_v15, %v741_v39  ;;  %v382_v23 = vsel %vm374_vm2, %v2417_v19, %v373_v13  ;;  %v390_v60 = vsel %vm374_vm2, %v373_v13, %v2417_v19  ;;  %v2823_v34 = vld [vmem:[#allocation21_spill] sm:$0xff]  ;;  %v2825_v40 = vld [vmem:[#allocation32_spill] sm:$0xff] }
 0x27d   :  { %v418_v37 = vmul.f32 %v1698_v2, %v390_v60  ;;  %v419_v9 = vmul.f32 %v1701_v3, %v382_v23  ;;  %v2809_v3 = vpack.c.bf16 %v2357_v25, %v2347_v56  ;;  %v2810_v25 = vpack.c.bf16 %v2354_v1, %v2344_v48  ;;  %v2813_v1 = vld [vmem:[#allocation19_spill] sm:$0xff]  ;;  %v2827_v23 = vld [vmem:[#allocation24_spill] sm:$0xff]  ;;  %v2828_v60 = vld [vmem:[#allocation17_spill] sm:$0xff] }
 0x27e   :  { %1000 = vmatpush1.bf16.msra.mxu0 %v2807_v32  ;;  %v457_v54 = vpop.permute.xlu0 %456  ;;  %1049 = vmatpush1.bf16.msra.mxu1 %v2808_v16  ;;  %v2815_v0 = vpack.c.bf16 %v2813_v1, %v2814_v35  ;;  %v2831_v16 = vld [vmem:[#allocation49_spill] sm:$0xff] }
 0x27f   :  { %v426_v51 = vpack.c.bf16 %v418_v37, %v416_v20  ;;  %v467_v11 = vsel %vm460_vm4, %v2421_v36, %v457_v54  ;;  %v475_v2 = vsel %vm460_vm4, %v457_v54, %v2421_v36  ;;  %v725_v19 = vpop.permute.xlu1 %724  ;;  %1050 = vmatprep.subr.bf16.mxu1 %v2809_v3  ;;  %v427_v4 = vpack.c.bf16 %v419_v9, %v417_v55  ;;  %v2820_v20 = vld [vmem:[#allocation18_spill] sm:$0xff]  ;;  %v2830_v54 = vld [vmem:[#allocation51_spill] sm:$0xff]  ;;  %v2844_v1 = vld [vmem:[#allocation53_spill] sm:$0xff] }
 0x280   :  { %v502_v31 = vmul.f32 %v1752_v29, %v475_v2  ;;  %v503_v42 = vmul.f32 %v1755_v30, %v467_v11  ;;  %v734_v10 = vsel %vm726_vm3, %v2419_v57, %v725_v19  ;;  %v742_v49 = vsel %vm726_vm3, %v725_v19, %v2419_v57  ;;  %v2833_v11 = vld [vmem:[#allocation39_spill] sm:$0xff]  ;;  %v2834_v2 = vld [vmem:[#allocation37_spill] sm:$0xff] }
 0x281   :  { %v770_v36 = vmul.f32 %v1724_v14, %v734_v10  ;;  %v771_v7 = vmul.f32 %v1727_v15, %v742_v49  ;;  %1001 = vmatprep.subr.bf16.mxu0 %v427_v4  ;;  %v2811_v14 = vpack.c.bf16 %v1868_v62, %v1812_v17  ;;  %v2821_v55 = vpack.c.bf16 %v2819_v59, %v2820_v20  ;;  %v2837_v49 = vld [vmem:[#allocation50_spill] sm:$0xff]  ;;  %v2848_v59 = vld [vmem:[#allocation52_spill] sm:$0xff] }
 0x282   :  { %1002 = vmatpush1.bf16.msra.mxu0 %v426_v51  ;;  %v809_v56 = vpop.permute.xlu0 %808  ;;  %1051 = vmatpush1.bf16.msra.mxu1 %v2810_v25  ;;  %v2829_v37 = vpack.c.bf16 %v2827_v23, %v2828_v60  ;;  %v2832_v51 = vpack.c.bf16 %v2830_v54, %v2831_v16  ;;  %v2835_v19 = vpack.c.bf16 %v2833_v11, %v2834_v2  ;;  %v2840_v25 = vld [vmem:[#allocation38_spill] sm:$0xff]  ;;  %v2860_v54 = vld [vmem:[#allocation27_spill] sm:$0xff] }
 0x283   :  { %v819_v22 = vsel %vm812_vm5, %v2425_v53, %v809_v56  ;;  %v827_v18 = vsel %vm812_vm5, %v809_v56, %v2425_v53  ;;  %v877_v57 = vpop.permute.xlu1 %876  ;;  %1003 = vmatprep.subr.bf16.mxu0 %v2811_v14  ;;  %v779_v15 = vpack.c.bf16 %v771_v7, %v769_v43  ;;  %v778_v8 = vpack.c.bf16 %v770_v36, %v768_v50  ;;  %v2838_v36 = vld [vmem:[#allocation48_spill] sm:$0xff]  ;;  %v2862_v2 = vld [vmem:[#allocation42_spill] sm:$0xff] }
 0x284   :  { %v854_v27 = vmul.f32 %v1790_v63, %v819_v22  ;;  %v855_v48 = vmul.f32 %v2812_v28, %v827_v18  ;;  %v2826_v50 = vpack.c.bf16 %v2824_v61, %v2825_v40  ;;  %v2839_v7 = vpack.c.bf16 %v2837_v49, %v2838_v36  ;;  %v2841_v22 = vld [vmem:[#allocation36_spill] sm:$0xff]  ;;  %v2854_v40 = vld [vmem:[#allocation22_spill] sm:$0xff]  ;;  %v2868_v36 = vld [vmem:[#allocation47_spill] sm:$0xff] }
 0x285   :  { %1052 = vmatprep.subr.bf16.mxu1 %v779_v15  ;;  %v2842_v18 = vpack.c.bf16 %v2840_v25, %v2841_v22 }
 0x286   :  { %1004 = vmatpush1.bf16.msra.mxu0 %v2815_v0  ;;  %v539_v5 = vpop.permute.xlu0 %538  ;;  %1053 = vmatpush1.bf16.msra.mxu1 %v778_v8 }
 0x287   :  { %v551_v53 = vsel %vm546_vm6, %v2453_v38, %v539_v5  ;;  %v559_v17 = vsel %vm546_vm6, %v539_v5, %v2453_v38  ;;  %v893_v62 = vpop.permute.xlu1 %892  ;;  %1005 = vmatprep.subr.bf16.mxu0 %v2818_v21  ;;  %1054 = vmatprep.subr.bf16.mxu1 %v2821_v55  ;;  %v2847_v21 = vld [vmem:[#allocation54_spill] sm:$0xff] }
 0x288   :  { %v2564_v45 = vmul.f32 %v1832_v26, %v559_v17  ;;  %v585_v46 = vmul.f32 %v1835_v47, %v551_v53  ;;  %v904_v44 = vsel %vm898_vm8, %v877_v57, %v893_v62  ;;  %v912_v38 = vsel %vm898_vm8, %v893_v62, %v877_v57  ;;  %v2846_v53 = vld [vmem:[#allocation57_spill] sm:$0xff] }
 0x289   :  { %v2572_v12 = vmul.f32 %v2822_v24, %v904_v44  ;;  %v2575_v39 = vmul.f32 %v2823_v34, %v912_v38  ;;  %v2849_v20 = vpack.c.bf16 %v2847_v21, %v2848_v59  ;;  %v2851_v44 = vld [vmem:[#allocation23_spill] sm:$0xff] }
 0x28a   :  { %v596_v13 = vpack.c.bf16 %v2478_v33, %v2564_v45  ;;  %1006 = vmatpush1.bf16.msra.mxu0 %v2826_v50  ;;  %v875_v43 = vpop.permute.xlu0 %874  ;;  %1055 = vmatpush1.bf16.msra.mxu1 %v2829_v37  ;;  %v597_v9 = vpack.c.bf16 %v2481_v41, %v585_v46  ;;  %v2836_v33 = vld [vmem:[#allocation56_spill] sm:$0xff]  ;;  %v2850_v46 = vld [vmem:[#allocation29_spill] sm:$0xff] }
 0x28b   :  { %v459_v32 = vpop.permute.xlu1 %458  ;;  %1007 = vmatprep.subr.bf16.mxu0 %v2832_v51  ;;  %1056 = vmatprep.subr.bf16.mxu1 %v2835_v19  ;;  %v2852_v38 = vpack.c.bf16 %v2850_v46, %v2851_v44  ;;  %v2863_v19 = vld [vmem:[#allocation40_spill] sm:$0xff] }
 0x28c   :  { %v468_v3 = vsel %vm460_vm4, %v2836_v33, %v459_v32  ;;  %v476_v4 = vsel %vm460_vm4, %v459_v32, %v2836_v33  ;;  %v2859_v32 = vld [vmem:[#allocation31_spill] sm:$0xff]  ;;  %v2864_v33 = vpack.c.bf16 %v2862_v2, %v2863_v19 }
 0x28d   :  { %v504_v10 = vmul.f32 %v1752_v29, %v476_v4  ;;  %v505_v41 = vmul.f32 %v1755_v30, %v468_v3  ;;  %v2843_v29 = vld [vmem:[#allocation55_spill] sm:$0xff]  ;;  %v2861_v16 = vpack.c.bf16 %v2859_v32, %v2860_v54  ;;  %v2865_v4 = vld [vmem:[#allocation30_spill] sm:$0xff] }
 0x28e   :  { %1008 = vmatpush1.bf16.msra.mxu0 %v2839_v7  ;;  %v891_v56 = vpop.permute.xlu0 %890  ;;  %1057 = vmatpush1.bf16.msra.mxu1 %v2842_v18  ;;  %v2845_v30 = vpack.c.bf16 %v2843_v29, %v2844_v1  ;;  %v2869_v7 = vld [vmem:[#allocation45_spill] sm:$0xff]  ;;  %v2871_v18 = vmov 0  }
 0x28f   :  { %v512_v57 = vpack.c.bf16 %v504_v10, %v502_v31  ;;  %v903_v14 = vsel %vm898_vm8, %v875_v43, %v891_v56  ;;  %v911_v15 = vsel %vm898_vm8, %v891_v56, %v875_v43  ;;  %v811_v8 = vpop.permute.xlu1 %810  ;;  %v513_v35 = vpack.c.bf16 %v505_v41, %v503_v42  ;;  %v2866_v10 = vld [vmem:[#allocation26_spill] sm:$0xff] }
 0x290   :  { %1058 = vmatprep.subr.bf16.mxu1 %v2845_v30  ;;  %v936_v0 = vmul.f32 %v2822_v24, %v903_v14  ;;  %v937_v5 = vmul.f32 %v2823_v34, %v911_v15  ;;  %v820_v31 = vsel %vm812_vm5, %v2846_v53, %v811_v8  ;;  %v828_v17 = vsel %vm812_vm5, %v811_v8, %v2846_v53  ;;  %v2872_v8 = vld [vmem:[#allocation46_spill] sm:$0xff] }
 0x291   :  { %v856_v62 = vmul.f32 %v1790_v63, %v820_v31  ;;  %v857_v6 = vmul.f32 %v2812_v28, %v828_v17  ;;  %1009 = vmatprep.subr.bf16.mxu0 %v513_v35  ;;  %v1187_v28 = vld [vmem:[%s2707_s6 + $0x8] ss:$20 sps:$4 sm:$0xff]   ;;  %v2867_v41 = vpack.c.bf16 %v2865_v4, %v2866_v10  ;;  %v2870_v56 = vpack.c.bf16 %v2868_v36, %v2869_v7 }
 0x292   :  { %v948_v52 = vpack.c.bf16 %v2572_v12, %v936_v0  ;;  %1010 = vmatpush1.bf16.msra.mxu0 %v512_v57  ;;  %v527_v42 = vpop.permute.xlu0 %526  ;;  %1059 = vmatpush1.bf16.msra.mxu1 %v2849_v20  ;;  %v949_v55 = vpack.c.bf16 %v2575_v39, %v937_v5  ;;  %v2853_v12 = vld [vmem:[#allocation28_spill] sm:$0xff] }
 0x293   :  { %v529_v45 = vpop.permute.xlu1 %528  ;;  %1011 = vmatprep.subr.bf16.mxu0 %v2852_v38  ;;  %v865_v61 = vpack.c.bf16 %v857_v6, %v855_v48  ;;  %v864_v63 = vpack.c.bf16 %v856_v62, %v854_v27  ;;  %v2855_v50 = vpack.c.bf16 %v2853_v12, %v2854_v40  ;;  %v2856_v48 = vld [vmem:[#allocation43_spill] sm:$0xff]  ;;  %v2857_v27 = vld [vmem:[#allocation41_spill] sm:$0xff] }
 0x294   :  { %v2858_v37 = vpack.c.bf16 %v2856_v48, %v2857_v27  ;;  %v1190_v62 = vld [vmem:[%s2707_s6] ss:$20 sps:$4 sm:$0xff]   ;;  %s1282_s6 = scalar_lea.vmem %s1126_s17, 512 }
 0x295   :  { %1060 = vmatprep.subr.bf16.mxu1 %v865_v61  ;;  %p1283_p4 = scmp.ne.s32.totalorder %s1126_s17, %s1282_s6  ;;  %p1288_p6 = scmp.lt.s32.totalorder %s1282_s6, %s1282_s6 }
 0x296   :  { %1012 = vmatpush1.bf16.msra.mxu0 %v2855_v50  ;;  %v543_v43 = vpop.permute.xlu0 %542  ;;  %1061 = vmatpush1.bf16.msra.mxu1 %v864_v63 }
 0x297   :  { %v553_v39 = vsel %vm546_vm6, %v527_v42, %v543_v43  ;;  %v561_v23 = vsel %vm546_vm6, %v543_v43, %v527_v42  ;;  %v881_v60 = vpop.permute.xlu1 %880  ;;  %1013 = vmatprep.subr.bf16.mxu0 %v2858_v37  ;;  %1073 = vmatprep.subr.bf16.mxu1 %v2861_v16  ;;  %p1289_p7 = por %p1288_p6, %p1287_p5 }
 0x298   :  { %v588_v51 = vmul.f32 %v1832_v26, %v561_v23  ;;  %v589_v11 = vmul.f32 %v1835_v47, %v553_v39 }
 0x299   :  { %1063 = vmatmul.mubr.bf16.vlgmr.msra.gmra.mrb[0].mxu1 %v1187_v28  ;;  %p1290_p8 = pnand %p1289_p7, %p1283_p4 }
 0x29a   :  { %1014 = vmatpush1.bf16.msra.mxu0 %v2864_v33  ;;  %v879_v3 = vpop.permute.xlu0 %878  ;;  %1074 = vmatpush1.bf16.msra.mxu1 %v2867_v41 }
 0x29b   :  { %v545_v49 = vpop.permute.xlu1 %544  ;;  %1015 = vmatprep.subr.bf16.mxu0 %v597_v9  ;;  %1075 = vmatprep.subr.bf16.mxu1 %v2870_v56  ;;  %v2873_v9 = vld [vmem:[#allocation44_spill] sm:$0xff] }
 0x29c   :  { %v554_v25 = vsel %vm546_vm6, %v529_v45, %v545_v49  ;;  %v562_v22 = vsel %vm546_vm6, %v545_v49, %v529_v45  ;;  %1105 = vmatprep.mubr.bf16.mxu1 %v2871_v18  ;;  %v2874_v29 = vpack.c.bf16 %v2872_v8, %v2873_v9 }
 0x29d   :  { %v590_v57 = vmul.f32 %v1832_v26, %v562_v22  ;;  %v591_v14 = vmul.f32 %v1835_v47, %v554_v25 }
 0x29e   :  { %1016 = vmatpush1.bf16.msra.mxu0 %v596_v13  ;;  %v895_v15 = vpop.permute.xlu0 %894  ;;  %1076 = vmatpush1.bf16.msra.mxu1 %v2874_v29 }
 0x29f   :  { %v598_v1 = vpack.c.bf16 %v590_v57, %v588_v51  ;;  %v905_v30 = vsel %vm898_vm8, %v879_v3, %v895_v15  ;;  %v913_v35 = vsel %vm898_vm8, %v895_v15, %v879_v3  ;;  %v897_v0 = vpop.permute.xlu1 %896  ;;  %1077 = vmatprep.subr.bf16.mxu1 %v949_v55  ;;  %v599_v5 = vpack.c.bf16 %v591_v14, %v589_v11 }
 0x2a0   :  { %v940_v26 = vmul.f32 %v2822_v24, %v905_v30  ;;  %v941_v47 = vmul.f32 %v2823_v34, %v913_v35  ;;  %v906_v13 = vsel %vm898_vm8, %v881_v60, %v897_v0  ;;  %v914_v53 = vsel %vm898_vm8, %v897_v0, %v881_v60 }
 0x2a1   :  { %v942_v31 = vmul.f32 %v2822_v24, %v906_v13  ;;  %v943_v17 = vmul.f32 %v2823_v34, %v914_v53  ;;  %1017 = vmatprep.subr.bf16.mxu0 %v599_v5 }
 0x2a2   :  { %1018 = vmatpush1.bf16.msra.mxu0 %v598_v1  ;;  %1078 = vmatpush1.bf16.msra.mxu1 %v948_v52 }
 0x2a3   :  { %v950_v6 = vpack.c.bf16 %v942_v31, %v940_v26  ;;  %v951_v42 = vpack.c.bf16 %v943_v17, %v941_v47 }
 0x2a5   :  { %1079 = vmatprep.subr.bf16.mxu1 %v951_v42  ;;  %1020 = vmatmul.mubr.bf16.vlgmr.msra.gmra.mrb[16].mxu0 %v1190_v62 }
 0x2a6   :  { %1080 = vmatpush1.bf16.msra.mxu1 %v950_v6 }
 0x2a9   :  { %1159 = vmatmul.mubr.msk.bf16.vlgmr.msra.gmra.mrb[0].mxu1 %vm983_vm9, %v1193_v58 }
 0x378   :  { %v1021_v24 = vpop.f32.mrb[16].mxu0 }
 0x379   :  { %v1023_v34 = vpop.f32.mrb[17].mxu0 }
 0x37a   :  { %v1025_v21 = vpop.f32.mrb[18].mxu0 }
 0x37b   :  { %v1027_v59 = vpop.f32.mrb[19].mxu0 }
 0x37c   :  { %v1107_v20 = vpop.f32.mrb[0].mxu1 }
 0x37d   :  { %v1160_v55 = vadd.f32 %v1107_v20, %v1021_v24  ;;  %v1109_v45 = vpop.f32.mrb[1].mxu1 }
 0x37e   :  { %v1161_v52 = vadd.f32 %v1109_v45, %v1023_v34  ;;  %v1111_v46 = vpop.f32.mrb[2].mxu1 }
 0x37f   :  { %1116 = vst [vmem:[#allocation10] sm:$0xff] %v1160_v55  ;;  %v1162_v44 = vadd.f32 %v1111_v46, %v1025_v21  ;;  %v1113_v38 = vpop.f32.mrb[3].mxu1 }
 0x380   :  { %1117 = vst [vmem:[#allocation10 + $0x8] sm:$0xff] %v1161_v52  ;;  %v1163_v61 = vadd.f32 %v1113_v38, %v1027_v59 }
 0x381   :  { %1118 = vst [vmem:[#allocation10 + $0x10] sm:$0xff] %v1162_v44 }
 0x382   :  { %1119 = vst [vmem:[#allocation10 + $0x18] sm:$0xff] %v1163_v61 }
 0x383   :  { %1293 = shalt.err (!%p1290_p8)
}
 0x384   :  { %s1294_s20 = scalar_lea.hbm %s2708_s7, 512 }
 0x385   :  { %p1295_p9 = scmp.ne.s32.totalorder %s2708_s7, %s1294_s20  ;;  %p1298_p10 = scmp.lt.u32.totalorder %s1294_s20, %s2708_s7 }
 0x387   :  { %p1300_p11 = pnand %p1298_p10, %p1295_p9 }
 0x389   :  { %1303 = shalt.err (!%p1300_p11)
}
 0x38a   :  { %1131 = dma.vmem_to_hbm [thread:$0]  %s1126_s17, 512, %s2708_s7, [#allocation4], %s1314_s13, %s1314_s13, %s1315_s14  }
 0x38b   :  { %1310 = dma.done.wait [#allocation4], 512  }
 0x38c   :  { %1311 = vsyncadd [#allocation4], 4294966784 }
 0x38d   :  { %1135 = vsyncpa [#allocation3], 1 }
 0x38e   :  { %1136 = vsyncpa [#allocation6], 1 }
 0x38f   :  { %1137 = vsyncpa [#allocation9], 1 }
 0x390   :  { %1138 = vsyncpa [#allocation4], 1 }

</bundles_post_ra>
